<compile_context>
chip_gen: v5e
topology: v5e:2x2
jax: 0.10.0
libtpu: 0.0.40
codegen_flags: <defaults>
</compile_context>

<pallas_src>
import jax
import jax.numpy as jnp
from jax.experimental import pallas as pl
from jax.experimental.pallas import tpu as pltpu

NEG_INF = -1e30
_MAX_RNN_UNROLL = 8   # full unroll only while L/T are short (perf review item)


# ---------------------------------------------------------------------------
# Fused NMT forward kernel (no grid: one invocation, everything VMEM-resident)
# ---------------------------------------------------------------------------
def _nmt_fused_kernel(src_emb_ref, tgt_emb_ref, mask_ref,
                      enc_wih_ref, enc_whh_ref, enc_b_ref,
                      dec_wih_ref, dec_whh_ref, dec_b_ref,
                      wa_ref, wcc_ref, wch_ref,
                      out_ref, att_ref,
                      mem_scr, hdec_scr, mem_bm_scr, hdec_bm_scr):
    f32 = jnp.float32
    L, B, E = src_emb_ref.shape          # src_len, batch, emb
    T = tgt_emb_ref.shape[0]             # tgt_len - 1
    H = enc_whh_ref.shape[0]

    enc_whh = enc_whh_ref[...]           # (H, H)
    dec_whh = dec_whh_ref[...]           # (H, H)

    # ----- hoisted input projections (bias folded), one batched MXU issue
    #       each, written into the scratch slabs the recurrences update ------
    mem_scr[...] = (
        jnp.einsum('lbe,leh->lbh', src_emb_ref[...],
                   jnp.broadcast_to(enc_wih_ref[...], (L, E, H)),
                   preferred_element_type=f32)
        + enc_b_ref[...])                                    # (L, B, H)
    hdec_scr[...] = (
        jnp.einsum('tbe,teh->tbh', tgt_emb_ref[...],
                   jnp.broadcast_to(dec_wih_ref[...], (T, E, H)),
                   preferred_element_type=f32)
        + dec_b_ref[...])                                    # (T, B, H)

    # ----- encoder recurrence:  h_t = tanh(x_proj_t + h_{t-1} @ W_hh) -------
    def enc_step(t, h):
        h_new = jnp.tanh(mem_scr[t]
                         + jnp.dot(h, enc_whh, preferred_element_type=f32))
        mem_scr[t] = h_new                                   # memory_bank
        return h_new

    enc_state = jax.lax.fori_loop(0, L, enc_step, jnp.zeros((B, H), f32),
                                  unroll=min(L, _MAX_RNN_UNROLL))

    # ----- decoder recurrence (decoder.init_state: h0 = enc_state) ----------
    def dec_step(t, h):
        h_new = jnp.tanh(hdec_scr[t]
                         + jnp.dot(h, dec_whh, preferred_element_type=f32))
        hdec_scr[t] = h_new
        return h_new

    jax.lax.fori_loop(0, T, dec_step, enc_state,
                      unroll=min(T, _MAX_RNN_UNROLL))

    # ----- repack time-major -> batch-major once (B tiny & static) ----------
    for b in range(B):
        mem_bm_scr[b] = mem_scr[:, b, :]                     # (S, H)
        hdec_bm_scr[b] = hdec_scr[:, b, :]                   # (T, H)
    mem_bm = mem_bm_scr[...]                                 # (B, S, H)
    h_bm = hdec_bm_scr[...]                                  # (B, T, H)

    # ----- Luong "general" attention, whole batch & all T steps at once -----
    wa_b = jnp.broadcast_to(wa_ref[...], (B, H, H))
    wcc_b = jnp.broadcast_to(wcc_ref[...], (B, H, H))
    wch_b = jnp.broadcast_to(wch_ref[...], (B, H, H))

    hW = jnp.einsum('bth,bhk->btk', h_bm, wa_b,
                    preferred_element_type=f32)              # (B, T, H)
    scores = jnp.einsum('btk,bsk->bts', hW, mem_bm,
                        preferred_element_type=f32)          # (B, T, S)
    scores = scores + mask_ref[...]                          # additive mask

    m = jnp.max(scores, axis=-1, keepdims=True)
    p = jnp.exp(scores - m)
    attn = p / jnp.sum(p, axis=-1, keepdims=True)            # exact softmax

    ctx = jnp.einsum('bts,bsh->bth', attn, mem_bm,
                     preferred_element_type=f32)             # (B, T, H)
    dec = jnp.tanh(
        jnp.einsum('bth,bhk->btk', ctx, wcc_b, preferred_element_type=f32)
        + jnp.einsum('bth,bhk->btk', h_bm, wch_b, preferred_element_type=f32))

    out_ref[...] = dec                                       # one slab store
    att_ref[...] = attn                                      # one slab store


# ---------------------------------------------------------------------------
# Parameters
# ---------------------------------------------------------------------------
def init_params(key, src_vocab=20, tgt_vocab=22, emb=16, hidden=32):
    ks = jax.random.split(key, 10)
    s = 0.1
    return {
        "src_emb": s * jax.random.normal(ks[0], (src_vocab, emb), jnp.float32),
        "tgt_emb": s * jax.random.normal(ks[1], (tgt_vocab, emb), jnp.float32),
        "enc_w_ih": s * jax.random.normal(ks[2], (emb, hidden), jnp.float32),
        "enc_w_hh": s * jax.random.normal(ks[3], (hidden, hidden), jnp.float32),
        "enc_b": s * jax.random.normal(ks[4], (1, hidden), jnp.float32),
        "dec_w_ih": s * jax.random.normal(ks[5], (emb, hidden), jnp.float32),
        "dec_w_hh": s * jax.random.normal(ks[6], (hidden, hidden), jnp.float32),
        "dec_b": s * jax.random.normal(ks[7], (1, hidden), jnp.float32),
        "attn_w_a": s * jax.random.normal(ks[8], (hidden, hidden), jnp.float32),
        "attn_w_c": s * jax.random.normal(ks[9], (2 * hidden, hidden), jnp.float32),
    }


# ---------------------------------------------------------------------------
# NMTModel.forward (bptt=False)
# ---------------------------------------------------------------------------
@jax.jit
def nmt_forward(params, src, tgt, lengths):
    """src: (src_len, batch, 1) int32; tgt: (tgt_len, batch) int32;
    lengths: (batch,) int32.
    Returns dec_out (tgt_len-1, batch, hidden) and
            attns {"std": (tgt_len-1, batch, src_len)}.
    """
    H = params["enc_w_hh"].shape[0]

    # Embedding lookups stay in plain JAX (gather glue).
    src_emb = params["src_emb"][src[..., 0]]                 # (L, B, E)
    tgt_emb = params["tgt_emb"][tgt[:-1]]                    # (T, B, E)
    L, B, _ = src_emb.shape
    T = tgt_emb.shape[0]

    # Additive source-length mask, built once outside the kernel (exact-shape
    # slab: no in-kernel SMEM reads, iota, or broadcast risk).
    keep = jnp.arange(L, dtype=jnp.int32)[None, :] < lengths.astype(jnp.int32)[:, None]
    mask = jnp.where(keep, 0.0, NEG_INF).astype(jnp.float32)        # (B, S)
    mask = jnp.broadcast_to(mask[:, None, :], (B, T, L))            # (B, T, S)

    enc_b = params["enc_b"].reshape(1, 1, H)
    dec_b = params["dec_b"].reshape(1, 1, H)
    wc_ctx = params["attn_w_c"][:H]                          # (H, H)
    wc_h = params["attn_w_c"][H:]                            # (H, H)

    out_bm, att_bm = pl.pallas_call(
        _nmt_fused_kernel,
        out_shape=(jax.ShapeDtypeStruct((B, T, H), jnp.float32),
                   jax.ShapeDtypeStruct((B, T, L), jnp.float32)),
        in_specs=[pl.BlockSpec(memory_space=pltpu.MemorySpace.VMEM)] * 12,
        out_specs=(pl.BlockSpec(memory_space=pltpu.MemorySpace.VMEM),
                   pl.BlockSpec(memory_space=pltpu.MemorySpace.VMEM)),
        scratch_shapes=[pltpu.VMEM((L, B, H), jnp.float32),   # memory_bank (time-major)
                        pltpu.VMEM((T, B, H), jnp.float32),   # dec hidden  (time-major)
                        pltpu.VMEM((B, L, H), jnp.float32),   # memory_bank (batch-major)
                        pltpu.VMEM((B, T, H), jnp.float32)],  # dec hidden  (batch-major)
    )(src_emb, tgt_emb, mask,
      params["enc_w_ih"], params["enc_w_hh"], enc_b,
      params["dec_w_ih"], params["dec_w_hh"], dec_b,
      params["attn_w_a"], wc_ctx, wc_h)

    # Layout plumbing back to the module convention (tgt_len, batch, ...).
    dec_out = jnp.transpose(out_bm, (1, 0, 2))
    attn_std = jnp.transpose(att_bm, (1, 0, 2))
    return dec_out, {"std": attn_std}


# ---------------------------------------------------------------------------
# Pure-JAX reference (for correctness check only)
# ---------------------------------------------------------------------------
def nmt_forward_ref(params, src, tgt, lengths):
    H = params["enc_w_hh"].shape[0]
    B = src.shape[1]
    tgt_in = tgt[:-1]

    def rnn(x_emb, h0, w_ih, w_hh, b):
        def step(h, x):
            h = jnp.tanh(x @ w_ih + h @ w_hh + b)
            return h, h
        h_fin, ys = jax.lax.scan(step, h0, x_emb)
        return ys, h_fin

    src_emb = params["src_emb"][src[..., 0]]
    mem, enc_state = rnn(src_emb, jnp.zeros((B, H), jnp.float32),
                         params["enc_w_ih"], params["enc_w_hh"], params["enc_b"])
    tgt_emb = params["tgt_emb"][tgt_in]
    dec_rnn, _ = rnn(tgt_emb, enc_state,
                     params["dec_w_ih"], params["dec_w_hh"], params["dec_b"])

    mem_bf = jnp.transpose(mem, (1, 0, 2))             # (B, S, H)
    hW = jnp.einsum('tbh,hk->tbk', dec_rnn, params["attn_w_a"])
    scores = jnp.einsum('tbh,bsh->tbs', hW, mem_bf)
    S = mem_bf.shape[1]
    mask = jnp.arange(S)[None, :] < lengths[:, None]   # (B, S)
    scores = jnp.where(mask[None], scores, NEG_INF)
    attn = jax.nn.softmax(scores, axis=-1)
    ctx = jnp.einsum('tbs,bsh->tbh', attn, mem_bf)
    w_c_ctx, w_c_h = params["attn_w_c"][:H], params["attn_w_c"][H:]
    dec_out = jnp.tanh(ctx @ w_c_ctx + dec_rnn @ w_c_h)
    return dec_out, {"std": attn}


if __name__ == "__main__":
    key = jax.random.PRNGKey(0)
    pkey, k_src, k_tgt = jax.random.split(key, 3)

    SRC_LEN, TGT_LEN, BATCH = 8, 9, 2
    SRC_VOCAB, TGT_VOCAB, EMB, HIDDEN = 20, 22, 16, 32

    params = init_params(pkey, SRC_VOCAB, TGT_VOCAB, EMB, HIDDEN)
    src = jax.random.randint(k_src, (SRC_LEN, BATCH, 1), 0, SRC_VOCAB, jnp.int32)
    tgt = jax.random.randint(k_tgt, (TGT_LEN, BATCH), 0, TGT_VOCAB, jnp.int32)
    lengths = jnp.array([8, 6], dtype=jnp.int32)

    dec_out, attns = nmt_forward(params, src, tgt, lengths)
    jax.block_until_ready((dec_out, attns))

    assert dec_out.shape == (TGT_LEN - 1, BATCH, HIDDEN)
    assert attns["std"].shape == (TGT_LEN - 1, BATCH, SRC_LEN)

    ref_out, ref_attns = nmt_forward_ref(params, src, tgt, lengths)
    # Exact softmax restored (no approx reciprocal) -> original tight tolerance.
    assert jnp.allclose(dec_out, ref_out, atol=1e-4, rtol=1e-4)
    assert jnp.allclose(attns["std"], ref_attns["std"], atol=1e-4, rtol=1e-4)

    print("KERNEL_OK")
</pallas_src>

<mosaic_0001>
module attributes {stable_mosaic.version = 11 : i64} {
  func.func @_nmt_fused_kernel(%arg0: memref<8x2x16xf32, #tpu.memory_space<vmem>>, %arg1: memref<8x2x16xf32, #tpu.memory_space<vmem>>, %arg2: memref<2x8x8xf32, #tpu.memory_space<vmem>>, %arg3: memref<16x32xf32, #tpu.memory_space<vmem>>, %arg4: memref<32x32xf32, #tpu.memory_space<vmem>>, %arg5: memref<1x1x32xf32, #tpu.memory_space<vmem>>, %arg6: memref<16x32xf32, #tpu.memory_space<vmem>>, %arg7: memref<32x32xf32, #tpu.memory_space<vmem>>, %arg8: memref<1x1x32xf32, #tpu.memory_space<vmem>>, %arg9: memref<32x32xf32, #tpu.memory_space<vmem>>, %arg10: memref<32x32xf32, #tpu.memory_space<vmem>>, %arg11: memref<32x32xf32, #tpu.memory_space<vmem>>, %arg12: memref<2x8x32xf32, #tpu.memory_space<vmem>>, %arg13: memref<2x8x8xf32, #tpu.memory_space<vmem>>, %arg14: memref<8x2x32xf32, #tpu.memory_space<vmem>>, %arg15: memref<8x2x32xf32, #tpu.memory_space<vmem>>, %arg16: memref<2x8x32xf32, #tpu.memory_space<vmem>>, %arg17: memref<2x8x32xf32, #tpu.memory_space<vmem>>) attributes {dimension_semantics = [], scalar_prefetch = 0 : i64, scratch_operands = 4 : i64, tpu.core_type = #tpu.core_type<tc>} {
    %c0 = arith.constant 0 : index
    %c0_0 = arith.constant 0 : index
    %0 = vector.load %arg4[%c0, %c0_0] : memref<32x32xf32, #tpu.memory_space<vmem>>, vector<32x32xf32>
    %c0_1 = arith.constant 0 : index
    %c0_2 = arith.constant 0 : index
    %1 = vector.load %arg7[%c0_1, %c0_2] : memref<32x32xf32, #tpu.memory_space<vmem>>, vector<32x32xf32>
    %c0_3 = arith.constant 0 : index
    %c0_4 = arith.constant 0 : index
    %c0_5 = arith.constant 0 : index
    %2 = vector.load %arg0[%c0_3, %c0_4, %c0_5] : memref<8x2x16xf32, #tpu.memory_space<vmem>>, vector<8x2x16xf32>
    %c0_6 = arith.constant 0 : index
    %c0_7 = arith.constant 0 : index
    %3 = vector.load %arg3[%c0_6, %c0_7] : memref<16x32xf32, #tpu.memory_space<vmem>>, vector<16x32xf32>
    %4 = vector.shape_cast %3 : vector<16x32xf32> to vector<1x16x32xf32>
    %5 = vector.broadcast %4 : vector<1x16x32xf32> to vector<8x16x32xf32>
    "tpu.trace_start"() <{level = 10 : i32, message = "lbe,leh->lbh"}> : () -> ()
    %cst = arith.constant dense<0.000000e+00> : vector<8x2x32xf32>
    %6 = tpu.matmul %2, %5, %cst {dimension_numbers = #tpu.dot_dimension_numbers<[2], [1], [1], [2], [0, 0, 0, 1, 1, 2], [0], [0]>} : vector<8x2x16xf32>, vector<8x16x32xf32>, vector<8x2x32xf32> -> vector<8x2x32xf32>
    "tpu.trace_stop"() : () -> ()
    %c0_8 = arith.constant 0 : index
    %c0_9 = arith.constant 0 : index
    %c0_10 = arith.constant 0 : index
    %7 = vector.load %arg5[%c0_8, %c0_9, %c0_10] : memref<1x1x32xf32, #tpu.memory_space<vmem>>, vector<1x1x32xf32>
    %8 = vector.broadcast %7 : vector<1x1x32xf32> to vector<8x2x32xf32>
    %9 = arith.addf %6, %8 : vector<8x2x32xf32>
    %c0_11 = arith.constant 0 : index
    %c0_12 = arith.constant 0 : index
    %c0_13 = arith.constant 0 : index
    %10 = vector.load %arg14[%c0_11, %c0_12, %c0_13] : memref<8x2x32xf32, #tpu.memory_space<vmem>>, vector<8x2x32xf32>
    tpu.vector_store %arg14[%c0_11, %c0_12, %c0_13], %9 {strides = array<i32>} : memref<8x2x32xf32, #tpu.memory_space<vmem>>, vector<8x2x32xf32>,
    %c0_14 = arith.constant 0 : index
    %c0_15 = arith.constant 0 : index
    %c0_16 = arith.constant 0 : index
    %11 = vector.load %arg1[%c0_14, %c0_15, %c0_16] : memref<8x2x16xf32, #tpu.memory_space<vmem>>, vector<8x2x16xf32>
    %c0_17 = arith.constant 0 : index
    %c0_18 = arith.constant 0 : index
    %12 = vector.load %arg6[%c0_17, %c0_18] : memref<16x32xf32, #tpu.memory_space<vmem>>, vector<16x32xf32>
    %13 = vector.shape_cast %12 : vector<16x32xf32> to vector<1x16x32xf32>
    %14 = vector.broadcast %13 : vector<1x16x32xf32> to vector<8x16x32xf32>
    "tpu.trace_start"() <{level = 10 : i32, message = "tbe,teh->tbh"}> : () -> ()
    %cst_19 = arith.constant dense<0.000000e+00> : vector<8x2x32xf32>
    %15 = tpu.matmul %11, %14, %cst_19 {dimension_numbers = #tpu.dot_dimension_numbers<[2], [1], [1], [2], [0, 0, 0, 1, 1, 2], [0], [0]>} : vector<8x2x16xf32>, vector<8x16x32xf32>, vector<8x2x32xf32> -> vector<8x2x32xf32>
    "tpu.trace_stop"() : () -> ()
    %c0_20 = arith.constant 0 : index
    %c0_21 = arith.constant 0 : index
    %c0_22 = arith.constant 0 : index
    %16 = vector.load %arg8[%c0_20, %c0_21, %c0_22] : memref<1x1x32xf32, #tpu.memory_space<vmem>>, vector<1x1x32xf32>
    %17 = vector.broadcast %16 : vector<1x1x32xf32> to vector<8x2x32xf32>
    %18 = arith.addf %15, %17 : vector<8x2x32xf32>
    %c0_23 = arith.constant 0 : index
    %c0_24 = arith.constant 0 : index
    %c0_25 = arith.constant 0 : index
    %19 = vector.load %arg15[%c0_23, %c0_24, %c0_25] : memref<8x2x32xf32, #tpu.memory_space<vmem>>, vector<8x2x32xf32>
    tpu.vector_store %arg15[%c0_23, %c0_24, %c0_25], %18 {strides = array<i32>} : memref<8x2x32xf32, #tpu.memory_space<vmem>>, vector<8x2x32xf32>,
    %cst_26 = arith.constant 0.000000e+00 : f32
    %20 = vector.broadcast %cst_26 : f32 to vector<2x32xf32>
    %c0_i32 = arith.constant 0 : i32
    %21 = arith.index_cast %c0_i32 : i32 to index
    %c0_27 = arith.constant 0 : index
    %c0_28 = arith.constant 0 : index
    %22 = vector.load %arg14[%21, %c0_27, %c0_28] : memref<8x2x32xf32, #tpu.memory_space<vmem>>, vector<1x2x32xf32>
    %23 = vector.shape_cast %22 : vector<1x2x32xf32> to vector<2x32xf32>
    %cst_29 = arith.constant dense<0.000000e+00> : vector<2x32xf32>
    %24 = tpu.matmul %20, %0, %cst_29 {dimension_numbers = #tpu.dot_dimension_numbers<[1], [0], [0], [1], [0, 0, 1, 1], [], []>} : vector<2x32xf32>, vector<32x32xf32>, vector<2x32xf32> -> vector<2x32xf32>
    %25 = arith.addf %23, %24 : vector<2x32xf32>
    %26 = math.tanh %25 : vector<2x32xf32>
    %27 = arith.index_cast %c0_i32 : i32 to index
    %c0_30 = arith.constant 0 : index
    %c0_31 = arith.constant 0 : index
    %28 = vector.load %arg14[%27, %c0_30, %c0_31] : memref<8x2x32xf32, #tpu.memory_space<vmem>>, vector<1x2x32xf32>
    %29 = vector.shape_cast %28 : vector<1x2x32xf32> to vector<2x32xf32>
    %30 = vector.shape_cast %26 : vector<2x32xf32> to vector<1x2x32xf32>
    tpu.vector_store %arg14[%27, %c0_30, %c0_31], %30 {strides = array<i32>} : memref<8x2x32xf32, #tpu.memory_space<vmem>>, vector<1x2x32xf32>,
    %c1_i32 = arith.constant 1 : i32
    %31 = arith.index_cast %c1_i32 : i32 to index
    %c0_32 = arith.constant 0 : index
    %c0_33 = arith.constant 0 : index
    %32 = vector.load %arg14[%31, %c0_32, %c0_33] : memref<8x2x32xf32, #tpu.memory_space<vmem>>, vector<1x2x32xf32>
    %33 = vector.shape_cast %32 : vector<1x2x32xf32> to vector<2x32xf32>
    %cst_34 = arith.constant dense<0.000000e+00> : vector<2x32xf32>
    %34 = tpu.matmul %26, %0, %cst_34 {dimension_numbers = #tpu.dot_dimension_numbers<[1], [0], [0], [1], [0, 0, 1, 1], [], []>} : vector<2x32xf32>, vector<32x32xf32>, vector<2x32xf32> -> vector<2x32xf32>
    %35 = arith.addf %33, %34 : vector<2x32xf32>
    %36 = math.tanh %35 : vector<2x32xf32>
    %37 = arith.index_cast %c1_i32 : i32 to index
    %c0_35 = arith.constant 0 : index
    %c0_36 = arith.constant 0 : index
    %38 = vector.load %arg14[%37, %c0_35, %c0_36] : memref<8x2x32xf32, #tpu.memory_space<vmem>>, vector<1x2x32xf32>
    %39 = vector.shape_cast %38 : vector<1x2x32xf32> to vector<2x32xf32>
    %40 = vector.shape_cast %36 : vector<2x32xf32> to vector<1x2x32xf32>
    tpu.vector_store %arg14[%37, %c0_35, %c0_36], %40 {strides = array<i32>} : memref<8x2x32xf32, #tpu.memory_space<vmem>>, vector<1x2x32xf32>,
    %c2_i32 = arith.constant 2 : i32
    %41 = arith.index_cast %c2_i32 : i32 to index
    %c0_37 = arith.constant 0 : index
    %c0_38 = arith.constant 0 : index
    %42 = vector.load %arg14[%41, %c0_37, %c0_38] : memref<8x2x32xf32, #tpu.memory_space<vmem>>, vector<1x2x32xf32>
    %43 = vector.shape_cast %42 : vector<1x2x32xf32> to vector<2x32xf32>
    %cst_39 = arith.constant dense<0.000000e+00> : vector<2x32xf32>
    %44 = tpu.matmul %36, %0, %cst_39 {dimension_numbers = #tpu.dot_dimension_numbers<[1], [0], [0], [1], [0, 0, 1, 1], [], []>} : vector<2x32xf32>, vector<32x32xf32>, vector<2x32xf32> -> vector<2x32xf32>
    %45 = arith.addf %43, %44 : vector<2x32xf32>
    %46 = math.tanh %45 : vector<2x32xf32>
    %47 = arith.index_cast %c2_i32 : i32 to index
    %c0_40 = arith.constant 0 : index
    %c0_41 = arith.constant 0 : index
    %48 = vector.load %arg14[%47, %c0_40, %c0_41] : memref<8x2x32xf32, #tpu.memory_space<vmem>>, vector<1x2x32xf32>
    %49 = vector.shape_cast %48 : vector<1x2x32xf32> to vector<2x32xf32>
    %50 = vector.shape_cast %46 : vector<2x32xf32> to vector<1x2x32xf32>
    tpu.vector_store %arg14[%47, %c0_40, %c0_41], %50 {strides = array<i32>} : memref<8x2x32xf32, #tpu.memory_space<vmem>>, vector<1x2x32xf32>,
    %c3_i32 = arith.constant 3 : i32
    %51 = arith.index_cast %c3_i32 : i32 to index
    %c0_42 = arith.constant 0 : index
    %c0_43 = arith.constant 0 : index
    %52 = vector.load %arg14[%51, %c0_42, %c0_43] : memref<8x2x32xf32, #tpu.memory_space<vmem>>, vector<1x2x32xf32>
    %53 = vector.shape_cast %52 : vector<1x2x32xf32> to vector<2x32xf32>
    %cst_44 = arith.constant dense<0.000000e+00> : vector<2x32xf32>
    %54 = tpu.matmul %46, %0, %cst_44 {dimension_numbers = #tpu.dot_dimension_numbers<[1], [0], [0], [1], [0, 0, 1, 1], [], []>} : vector<2x32xf32>, vector<32x32xf32>, vector<2x32xf32> -> vector<2x32xf32>
    %55 = arith.addf %53, %54 : vector<2x32xf32>
    %56 = math.tanh %55 : vector<2x32xf32>
    %57 = arith.index_cast %c3_i32 : i32 to index
    %c0_45 = arith.constant 0 : index
    %c0_46 = arith.constant 0 : index
    %58 = vector.load %arg14[%57, %c0_45, %c0_46] : memref<8x2x32xf32, #tpu.memory_space<vmem>>, vector<1x2x32xf32>
    %59 = vector.shape_cast %58 : vector<1x2x32xf32> to vector<2x32xf32>
    %60 = vector.shape_cast %56 : vector<2x32xf32> to vector<1x2x32xf32>
    tpu.vector_store %arg14[%57, %c0_45, %c0_46], %60 {strides = array<i32>} : memref<8x2x32xf32, #tpu.memory_space<vmem>>, vector<1x2x32xf32>,
    %c4_i32 = arith.constant 4 : i32
    %61 = arith.index_cast %c4_i32 : i32 to index
    %c0_47 = arith.constant 0 : index
    %c0_48 = arith.constant 0 : index
    %62 = vector.load %arg14[%61, %c0_47, %c0_48] : memref<8x2x32xf32, #tpu.memory_space<vmem>>, vector<1x2x32xf32>
    %63 = vector.shape_cast %62 : vector<1x2x32xf32> to vector<2x32xf32>
    %cst_49 = arith.constant dense<0.000000e+00> : vector<2x32xf32>
    %64 = tpu.matmul %56, %0, %cst_49 {dimension_numbers = #tpu.dot_dimension_numbers<[1], [0], [0], [1], [0, 0, 1, 1], [], []>} : vector<2x32xf32>, vector<32x32xf32>, vector<2x32xf32> -> vector<2x32xf32>
    %65 = arith.addf %63, %64 : vector<2x32xf32>
    %66 = math.tanh %65 : vector<2x32xf32>
    %67 = arith.index_cast %c4_i32 : i32 to index
    %c0_50 = arith.constant 0 : index
    %c0_51 = arith.constant 0 : index
    %68 = vector.load %arg14[%67, %c0_50, %c0_51] : memref<8x2x32xf32, #tpu.memory_space<vmem>>, vector<1x2x32xf32>
    %69 = vector.shape_cast %68 : vector<1x2x32xf32> to vector<2x32xf32>
    %70 = vector.shape_cast %66 : vector<2x32xf32> to vector<1x2x32xf32>
    tpu.vector_store %arg14[%67, %c0_50, %c0_51], %70 {strides = array<i32>} : memref<8x2x32xf32, #tpu.memory_space<vmem>>, vector<1x2x32xf32>,
    %c5_i32 = arith.constant 5 : i32
    %71 = arith.index_cast %c5_i32 : i32 to index
    %c0_52 = arith.constant 0 : index
    %c0_53 = arith.constant 0 : index
    %72 = vector.load %arg14[%71, %c0_52, %c0_53] : memref<8x2x32xf32, #tpu.memory_space<vmem>>, vector<1x2x32xf32>
    %73 = vector.shape_cast %72 : vector<1x2x32xf32> to vector<2x32xf32>
    %cst_54 = arith.constant dense<0.000000e+00> : vector<2x32xf32>
    %74 = tpu.matmul %66, %0, %cst_54 {dimension_numbers = #tpu.dot_dimension_numbers<[1], [0], [0], [1], [0, 0, 1, 1], [], []>} : vector<2x32xf32>, vector<32x32xf32>, vector<2x32xf32> -> vector<2x32xf32>
    %75 = arith.addf %73, %74 : vector<2x32xf32>
    %76 = math.tanh %75 : vector<2x32xf32>
    %77 = arith.index_cast %c5_i32 : i32 to index
    %c0_55 = arith.constant 0 : index
    %c0_56 = arith.constant 0 : index
    %78 = vector.load %arg14[%77, %c0_55, %c0_56] : memref<8x2x32xf32, #tpu.memory_space<vmem>>, vector<1x2x32xf32>
    %79 = vector.shape_cast %78 : vector<1x2x32xf32> to vector<2x32xf32>
    %80 = vector.shape_cast %76 : vector<2x32xf32> to vector<1x2x32xf32>
    tpu.vector_store %arg14[%77, %c0_55, %c0_56], %80 {strides = array<i32>} : memref<8x2x32xf32, #tpu.memory_space<vmem>>, vector<1x2x32xf32>,
    %c6_i32 = arith.constant 6 : i32
    %81 = arith.index_cast %c6_i32 : i32 to index
    %c0_57 = arith.constant 0 : index
    %c0_58 = arith.constant 0 : index
    %82 = vector.load %arg14[%81, %c0_57, %c0_58] : memref<8x2x32xf32, #tpu.memory_space<vmem>>, vector<1x2x32xf32>
    %83 = vector.shape_cast %82 : vector<1x2x32xf32> to vector<2x32xf32>
    %cst_59 = arith.constant dense<0.000000e+00> : vector<2x32xf32>
    %84 = tpu.matmul %76, %0, %cst_59 {dimension_numbers = #tpu.dot_dimension_numbers<[1], [0], [0], [1], [0, 0, 1, 1], [], []>} : vector<2x32xf32>, vector<32x32xf32>, vector<2x32xf32> -> vector<2x32xf32>
    %85 = arith.addf %83, %84 : vector<2x32xf32>
    %86 = math.tanh %85 : vector<2x32xf32>
    %87 = arith.index_cast %c6_i32 : i32 to index
    %c0_60 = arith.constant 0 : index
    %c0_61 = arith.constant 0 : index
    %88 = vector.load %arg14[%87, %c0_60, %c0_61] : memref<8x2x32xf32, #tpu.memory_space<vmem>>, vector<1x2x32xf32>
    %89 = vector.shape_cast %88 : vector<1x2x32xf32> to vector<2x32xf32>
    %90 = vector.shape_cast %86 : vector<2x32xf32> to vector<1x2x32xf32>
    tpu.vector_store %arg14[%87, %c0_60, %c0_61], %90 {strides = array<i32>} : memref<8x2x32xf32, #tpu.memory_space<vmem>>, vector<1x2x32xf32>,
    %c7_i32 = arith.constant 7 : i32
    %91 = arith.index_cast %c7_i32 : i32 to index
    %c0_62 = arith.constant 0 : index
    %c0_63 = arith.constant 0 : index
    %92 = vector.load %arg14[%91, %c0_62, %c0_63] : memref<8x2x32xf32, #tpu.memory_space<vmem>>, vector<1x2x32xf32>
    %93 = vector.shape_cast %92 : vector<1x2x32xf32> to vector<2x32xf32>
    %cst_64 = arith.constant dense<0.000000e+00> : vector<2x32xf32>
    %94 = tpu.matmul %86, %0, %cst_64 {dimension_numbers = #tpu.dot_dimension_numbers<[1], [0], [0], [1], [0, 0, 1, 1], [], []>} : vector<2x32xf32>, vector<32x32xf32>, vector<2x32xf32> -> vector<2x32xf32>
    %95 = arith.addf %93, %94 : vector<2x32xf32>
    %96 = math.tanh %95 : vector<2x32xf32>
    %97 = arith.index_cast %c7_i32 : i32 to index
    %c0_65 = arith.constant 0 : index
    %c0_66 = arith.constant 0 : index
    %98 = vector.load %arg14[%97, %c0_65, %c0_66] : memref<8x2x32xf32, #tpu.memory_space<vmem>>, vector<1x2x32xf32>
    %99 = vector.shape_cast %98 : vector<1x2x32xf32> to vector<2x32xf32>
    %100 = vector.shape_cast %96 : vector<2x32xf32> to vector<1x2x32xf32>
    tpu.vector_store %arg14[%97, %c0_65, %c0_66], %100 {strides = array<i32>} : memref<8x2x32xf32, #tpu.memory_space<vmem>>, vector<1x2x32xf32>,
    %c8_i32 = arith.constant 8 : i32
    %c0_i32_67 = arith.constant 0 : i32
    %101 = arith.index_cast %c0_i32_67 : i32 to index
    %c0_68 = arith.constant 0 : index
    %c0_69 = arith.constant 0 : index
    %102 = vector.load %arg15[%101, %c0_68, %c0_69] : memref<8x2x32xf32, #tpu.memory_space<vmem>>, vector<1x2x32xf32>
    %103 = vector.shape_cast %102 : vector<1x2x32xf32> to vector<2x32xf32>
    %cst_70 = arith.constant dense<0.000000e+00> : vector<2x32xf32>
    %104 = tpu.matmul %96, %1, %cst_70 {dimension_numbers = #tpu.dot_dimension_numbers<[1], [0], [0], [1], [0, 0, 1, 1], [], []>} : vector<2x32xf32>, vector<32x32xf32>, vector<2x32xf32> -> vector<2x32xf32>
    %105 = arith.addf %103, %104 : vector<2x32xf32>
    %106 = math.tanh %105 : vector<2x32xf32>
    %107 = arith.index_cast %c0_i32_67 : i32 to index
    %c0_71 = arith.constant 0 : index
    %c0_72 = arith.constant 0 : index
    %108 = vector.load %arg15[%107, %c0_71, %c0_72] : memref<8x2x32xf32, #tpu.memory_space<vmem>>, vector<1x2x32xf32>
    %109 = vector.shape_cast %108 : vector<1x2x32xf32> to vector<2x32xf32>
    %110 = vector.shape_cast %106 : vector<2x32xf32> to vector<1x2x32xf32>
    tpu.vector_store %arg15[%107, %c0_71, %c0_72], %110 {strides = array<i32>} : memref<8x2x32xf32, #tpu.memory_space<vmem>>, vector<1x2x32xf32>,
    %c1_i32_73 = arith.constant 1 : i32
    %111 = arith.index_cast %c1_i32_73 : i32 to index
    %c0_74 = arith.constant 0 : index
    %c0_75 = arith.constant 0 : index
    %112 = vector.load %arg15[%111, %c0_74, %c0_75] : memref<8x2x32xf32, #tpu.memory_space<vmem>>, vector<1x2x32xf32>
    %113 = vector.shape_cast %112 : vector<1x2x32xf32> to vector<2x32xf32>
    %cst_76 = arith.constant dense<0.000000e+00> : vector<2x32xf32>
    %114 = tpu.matmul %106, %1, %cst_76 {dimension_numbers = #tpu.dot_dimension_numbers<[1], [0], [0], [1], [0, 0, 1, 1], [], []>} : vector<2x32xf32>, vector<32x32xf32>, vector<2x32xf32> -> vector<2x32xf32>
    %115 = arith.addf %113, %114 : vector<2x32xf32>
    %116 = math.tanh %115 : vector<2x32xf32>
    %117 = arith.index_cast %c1_i32_73 : i32 to index
    %c0_77 = arith.constant 0 : index
    %c0_78 = arith.constant 0 : index
    %118 = vector.load %arg15[%117, %c0_77, %c0_78] : memref<8x2x32xf32, #tpu.memory_space<vmem>>, vector<1x2x32xf32>
    %119 = vector.shape_cast %118 : vector<1x2x32xf32> to vector<2x32xf32>
    %120 = vector.shape_cast %116 : vector<2x32xf32> to vector<1x2x32xf32>
    tpu.vector_store %arg15[%117, %c0_77, %c0_78], %120 {strides = array<i32>} : memref<8x2x32xf32, #tpu.memory_space<vmem>>, vector<1x2x32xf32>,
    %c2_i32_79 = arith.constant 2 : i32
    %121 = arith.index_cast %c2_i32_79 : i32 to index
    %c0_80 = arith.constant 0 : index
    %c0_81 = arith.constant 0 : index
    %122 = vector.load %arg15[%121, %c0_80, %c0_81] : memref<8x2x32xf32, #tpu.memory_space<vmem>>, vector<1x2x32xf32>
    %123 = vector.shape_cast %122 : vector<1x2x32xf32> to vector<2x32xf32>
    %cst_82 = arith.constant dense<0.000000e+00> : vector<2x32xf32>
    %124 = tpu.matmul %116, %1, %cst_82 {dimension_numbers = #tpu.dot_dimension_numbers<[1], [0], [0], [1], [0, 0, 1, 1], [], []>} : vector<2x32xf32>, vector<32x32xf32>, vector<2x32xf32> -> vector<2x32xf32>
    %125 = arith.addf %123, %124 : vector<2x32xf32>
    %126 = math.tanh %125 : vector<2x32xf32>
    %127 = arith.index_cast %c2_i32_79 : i32 to index
    %c0_83 = arith.constant 0 : index
    %c0_84 = arith.constant 0 : index
    %128 = vector.load %arg15[%127, %c0_83, %c0_84] : memref<8x2x32xf32, #tpu.memory_space<vmem>>, vector<1x2x32xf32>
    %129 = vector.shape_cast %128 : vector<1x2x32xf32> to vector<2x32xf32>
    %130 = vector.shape_cast %126 : vector<2x32xf32> to vector<1x2x32xf32>
    tpu.vector_store %arg15[%127, %c0_83, %c0_84], %130 {strides = array<i32>} : memref<8x2x32xf32, #tpu.memory_space<vmem>>, vector<1x2x32xf32>,
    %c3_i32_85 = arith.constant 3 : i32
    %131 = arith.index_cast %c3_i32_85 : i32 to index
    %c0_86 = arith.constant 0 : index
    %c0_87 = arith.constant 0 : index
    %132 = vector.load %arg15[%131, %c0_86, %c0_87] : memref<8x2x32xf32, #tpu.memory_space<vmem>>, vector<1x2x32xf32>
    %133 = vector.shape_cast %132 : vector<1x2x32xf32> to vector<2x32xf32>
    %cst_88 = arith.constant dense<0.000000e+00> : vector<2x32xf32>
    %134 = tpu.matmul %126, %1, %cst_88 {dimension_numbers = #tpu.dot_dimension_numbers<[1], [0], [0], [1], [0, 0, 1, 1], [], []>} : vector<2x32xf32>, vector<32x32xf32>, vector<2x32xf32> -> vector<2x32xf32>
    %135 = arith.addf %133, %134 : vector<2x32xf32>
    %136 = math.tanh %135 : vector<2x32xf32>
    %137 = arith.index_cast %c3_i32_85 : i32 to index
    %c0_89 = arith.constant 0 : index
    %c0_90 = arith.constant 0 : index
    %138 = vector.load %arg15[%137, %c0_89, %c0_90] : memref<8x2x32xf32, #tpu.memory_space<vmem>>, vector<1x2x32xf32>
    %139 = vector.shape_cast %138 : vector<1x2x32xf32> to vector<2x32xf32>
    %140 = vector.shape_cast %136 : vector<2x32xf32> to vector<1x2x32xf32>
    tpu.vector_store %arg15[%137, %c0_89, %c0_90], %140 {strides = array<i32>} : memref<8x2x32xf32, #tpu.memory_space<vmem>>, vector<1x2x32xf32>,
    %c4_i32_91 = arith.constant 4 : i32
    %141 = arith.index_cast %c4_i32_91 : i32 to index
    %c0_92 = arith.constant 0 : index
    %c0_93 = arith.constant 0 : index
    %142 = vector.load %arg15[%141, %c0_92, %c0_93] : memref<8x2x32xf32, #tpu.memory_space<vmem>>, vector<1x2x32xf32>
    %143 = vector.shape_cast %142 : vector<1x2x32xf32> to vector<2x32xf32>
    %cst_94 = arith.constant dense<0.000000e+00> : vector<2x32xf32>
    %144 = tpu.matmul %136, %1, %cst_94 {dimension_numbers = #tpu.dot_dimension_numbers<[1], [0], [0], [1], [0, 0, 1, 1], [], []>} : vector<2x32xf32>, vector<32x32xf32>, vector<2x32xf32> -> vector<2x32xf32>
    %145 = arith.addf %143, %144 : vector<2x32xf32>
    %146 = math.tanh %145 : vector<2x32xf32>
    %147 = arith.index_cast %c4_i32_91 : i32 to index
    %c0_95 = arith.constant 0 : index
    %c0_96 = arith.constant 0 : index
    %148 = vector.load %arg15[%147, %c0_95, %c0_96] : memref<8x2x32xf32, #tpu.memory_space<vmem>>, vector<1x2x32xf32>
    %149 = vector.shape_cast %148 : vector<1x2x32xf32> to vector<2x32xf32>
    %150 = vector.shape_cast %146 : vector<2x32xf32> to vector<1x2x32xf32>
    tpu.vector_store %arg15[%147, %c0_95, %c0_96], %150 {strides = array<i32>} : memref<8x2x32xf32, #tpu.memory_space<vmem>>, vector<1x2x32xf32>,
    %c5_i32_97 = arith.constant 5 : i32
    %151 = arith.index_cast %c5_i32_97 : i32 to index
    %c0_98 = arith.constant 0 : index
    %c0_99 = arith.constant 0 : index
    %152 = vector.load %arg15[%151, %c0_98, %c0_99] : memref<8x2x32xf32, #tpu.memory_space<vmem>>, vector<1x2x32xf32>
    %153 = vector.shape_cast %152 : vector<1x2x32xf32> to vector<2x32xf32>
    %cst_100 = arith.constant dense<0.000000e+00> : vector<2x32xf32>
    %154 = tpu.matmul %146, %1, %cst_100 {dimension_numbers = #tpu.dot_dimension_numbers<[1], [0], [0], [1], [0, 0, 1, 1], [], []>} : vector<2x32xf32>, vector<32x32xf32>, vector<2x32xf32> -> vector<2x32xf32>
    %155 = arith.addf %153, %154 : vector<2x32xf32>
    %156 = math.tanh %155 : vector<2x32xf32>
    %157 = arith.index_cast %c5_i32_97 : i32 to index
    %c0_101 = arith.constant 0 : index
    %c0_102 = arith.constant 0 : index
    %158 = vector.load %arg15[%157, %c0_101, %c0_102] : memref<8x2x32xf32, #tpu.memory_space<vmem>>, vector<1x2x32xf32>
    %159 = vector.shape_cast %158 : vector<1x2x32xf32> to vector<2x32xf32>
    %160 = vector.shape_cast %156 : vector<2x32xf32> to vector<1x2x32xf32>
    tpu.vector_store %arg15[%157, %c0_101, %c0_102], %160 {strides = array<i32>} : memref<8x2x32xf32, #tpu.memory_space<vmem>>, vector<1x2x32xf32>,
    %c6_i32_103 = arith.constant 6 : i32
    %161 = arith.index_cast %c6_i32_103 : i32 to index
    %c0_104 = arith.constant 0 : index
    %c0_105 = arith.constant 0 : index
    %162 = vector.load %arg15[%161, %c0_104, %c0_105] : memref<8x2x32xf32, #tpu.memory_space<vmem>>, vector<1x2x32xf32>
    %163 = vector.shape_cast %162 : vector<1x2x32xf32> to vector<2x32xf32>
    %cst_106 = arith.constant dense<0.000000e+00> : vector<2x32xf32>
    %164 = tpu.matmul %156, %1, %cst_106 {dimension_numbers = #tpu.dot_dimension_numbers<[1], [0], [0], [1], [0, 0, 1, 1], [], []>} : vector<2x32xf32>, vector<32x32xf32>, vector<2x32xf32> -> vector<2x32xf32>
    %165 = arith.addf %163, %164 : vector<2x32xf32>
    %166 = math.tanh %165 : vector<2x32xf32>
    %167 = arith.index_cast %c6_i32_103 : i32 to index
    %c0_107 = arith.constant 0 : index
    %c0_108 = arith.constant 0 : index
    %168 = vector.load %arg15[%167, %c0_107, %c0_108] : memref<8x2x32xf32, #tpu.memory_space<vmem>>, vector<1x2x32xf32>
    %169 = vector.shape_cast %168 : vector<1x2x32xf32> to vector<2x32xf32>
    %170 = vector.shape_cast %166 : vector<2x32xf32> to vector<1x2x32xf32>
    tpu.vector_store %arg15[%167, %c0_107, %c0_108], %170 {strides = array<i32>} : memref<8x2x32xf32, #tpu.memory_space<vmem>>, vector<1x2x32xf32>,
    %c7_i32_109 = arith.constant 7 : i32
    %171 = arith.index_cast %c7_i32_109 : i32 to index
    %c0_110 = arith.constant 0 : index
    %c0_111 = arith.constant 0 : index
    %172 = vector.load %arg15[%171, %c0_110, %c0_111] : memref<8x2x32xf32, #tpu.memory_space<vmem>>, vector<1x2x32xf32>
    %173 = vector.shape_cast %172 : vector<1x2x32xf32> to vector<2x32xf32>
    %cst_112 = arith.constant dense<0.000000e+00> : vector<2x32xf32>
    %174 = tpu.matmul %166, %1, %cst_112 {dimension_numbers = #tpu.dot_dimension_numbers<[1], [0], [0], [1], [0, 0, 1, 1], [], []>} : vector<2x32xf32>, vector<32x32xf32>, vector<2x32xf32> -> vector<2x32xf32>
    %175 = arith.addf %173, %174 : vector<2x32xf32>
    %176 = math.tanh %175 : vector<2x32xf32>
    %177 = arith.index_cast %c7_i32_109 : i32 to index
    %c0_113 = arith.constant 0 : index
    %c0_114 = arith.constant 0 : index
    %178 = vector.load %arg15[%177, %c0_113, %c0_114] : memref<8x2x32xf32, #tpu.memory_space<vmem>>, vector<1x2x32xf32>
    %179 = vector.shape_cast %178 : vector<1x2x32xf32> to vector<2x32xf32>
    %180 = vector.shape_cast %176 : vector<2x32xf32> to vector<1x2x32xf32>
    tpu.vector_store %arg15[%177, %c0_113, %c0_114], %180 {strides = array<i32>} : memref<8x2x32xf32, #tpu.memory_space<vmem>>, vector<1x2x32xf32>,
    %c8_i32_115 = arith.constant 8 : i32
    %c0_116 = arith.constant 0 : index
    %c0_117 = arith.constant 0 : index
    %c0_118 = arith.constant 0 : index
    %181 = vector.load %arg14[%c0_116, %c0_117, %c0_118] : memref<8x2x32xf32, #tpu.memory_space<vmem>>, vector<8x1x32xf32>
    %182 = vector.shape_cast %181 : vector<8x1x32xf32> to vector<8x32xf32>
    %c0_119 = arith.constant 0 : index
    %c0_120 = arith.constant 0 : index
    %c0_121 = arith.constant 0 : index
    %183 = vector.load %arg16[%c0_119, %c0_120, %c0_121] : memref<2x8x32xf32, #tpu.memory_space<vmem>>, vector<1x8x32xf32>
    %184 = vector.shape_cast %183 : vector<1x8x32xf32> to vector<8x32xf32>
    %185 = vector.shape_cast %182 : vector<8x32xf32> to vector<1x8x32xf32>
    tpu.vector_store %arg16[%c0_119, %c0_120, %c0_121], %185 {strides = array<i32>} : memref<2x8x32xf32, #tpu.memory_space<vmem>>, vector<1x8x32xf32>,
    %c0_122 = arith.constant 0 : index
    %c0_123 = arith.constant 0 : index
    %c0_124 = arith.constant 0 : index
    %186 = vector.load %arg15[%c0_122, %c0_123, %c0_124] : memref<8x2x32xf32, #tpu.memory_space<vmem>>, vector<8x1x32xf32>
    %187 = vector.shape_cast %186 : vector<8x1x32xf32> to vector<8x32xf32>
    %c0_125 = arith.constant 0 : index
    %c0_126 = arith.constant 0 : index
    %c0_127 = arith.constant 0 : index
    %188 = vector.load %arg17[%c0_125, %c0_126, %c0_127] : memref<2x8x32xf32, #tpu.memory_space<vmem>>, vector<1x8x32xf32>
    %189 = vector.shape_cast %188 : vector<1x8x32xf32> to vector<8x32xf32>
    %190 = vector.shape_cast %187 : vector<8x32xf32> to vector<1x8x32xf32>
    tpu.vector_store %arg17[%c0_125, %c0_126, %c0_127], %190 {strides = array<i32>} : memref<2x8x32xf32, #tpu.memory_space<vmem>>, vector<1x8x32xf32>,
    %c0_128 = arith.constant 0 : index
    %c1 = arith.constant 1 : index
    %c0_129 = arith.constant 0 : index
    %191 = vector.load %arg14[%c0_128, %c1, %c0_129] : memref<8x2x32xf32, #tpu.memory_space<vmem>>, vector<8x1x32xf32>
    %192 = vector.shape_cast %191 : vector<8x1x32xf32> to vector<8x32xf32>
    %c1_130 = arith.constant 1 : index
    %c0_131 = arith.constant 0 : index
    %c0_132 = arith.constant 0 : index
    %193 = vector.load %arg16[%c1_130, %c0_131, %c0_132] : memref<2x8x32xf32, #tpu.memory_space<vmem>>, vector<1x8x32xf32>
    %194 = vector.shape_cast %193 : vector<1x8x32xf32> to vector<8x32xf32>
    %195 = vector.shape_cast %192 : vector<8x32xf32> to vector<1x8x32xf32>
    tpu.vector_store %arg16[%c1_130, %c0_131, %c0_132], %195 {strides = array<i32>} : memref<2x8x32xf32, #tpu.memory_space<vmem>>, vector<1x8x32xf32>,
    %c0_133 = arith.constant 0 : index
    %c1_134 = arith.constant 1 : index
    %c0_135 = arith.constant 0 : index
    %196 = vector.load %arg15[%c0_133, %c1_134, %c0_135] : memref<8x2x32xf32, #tpu.memory_space<vmem>>, vector<8x1x32xf32>
    %197 = vector.shape_cast %196 : vector<8x1x32xf32> to vector<8x32xf32>
    %c1_136 = arith.constant 1 : index
    %c0_137 = arith.constant 0 : index
    %c0_138 = arith.constant 0 : index
    %198 = vector.load %arg17[%c1_136, %c0_137, %c0_138] : memref<2x8x32xf32, #tpu.memory_space<vmem>>, vector<1x8x32xf32>
    %199 = vector.shape_cast %198 : vector<1x8x32xf32> to vector<8x32xf32>
    %200 = vector.shape_cast %197 : vector<8x32xf32> to vector<1x8x32xf32>
    tpu.vector_store %arg17[%c1_136, %c0_137, %c0_138], %200 {strides = array<i32>} : memref<2x8x32xf32, #tpu.memory_space<vmem>>, vector<1x8x32xf32>,
    %c0_139 = arith.constant 0 : index
    %c0_140 = arith.constant 0 : index
    %c0_141 = arith.constant 0 : index
    %201 = vector.load %arg16[%c0_139, %c0_140, %c0_141] : memref<2x8x32xf32, #tpu.memory_space<vmem>>, vector<2x8x32xf32>
    %c0_142 = arith.constant 0 : index
    %c0_143 = arith.constant 0 : index
    %c0_144 = arith.constant 0 : index
    %202 = vector.load %arg17[%c0_142, %c0_143, %c0_144] : memref<2x8x32xf32, #tpu.memory_space<vmem>>, vector<2x8x32xf32>
    %c0_145 = arith.constant 0 : index
    %c0_146 = arith.constant 0 : index
    %203 = vector.load %arg9[%c0_145, %c0_146] : memref<32x32xf32, #tpu.memory_space<vmem>>, vector<32x32xf32>
    %204 = vector.shape_cast %203 : vector<32x32xf32> to vector<1x32x32xf32>
    %205 = vector.broadcast %204 : vector<1x32x32xf32> to vector<2x32x32xf32>
    %c0_147 = arith.constant 0 : index
    %c0_148 = arith.constant 0 : index
    %206 = vector.load %arg10[%c0_147, %c0_148] : memref<32x32xf32, #tpu.memory_space<vmem>>, vector<32x32xf32>
    %207 = vector.shape_cast %206 : vector<32x32xf32> to vector<1x32x32xf32>
    %208 = vector.broadcast %207 : vector<1x32x32xf32> to vector<2x32x32xf32>
    %c0_149 = arith.constant 0 : index
    %c0_150 = arith.constant 0 : index
    %209 = vector.load %arg11[%c0_149, %c0_150] : memref<32x32xf32, #tpu.memory_space<vmem>>, vector<32x32xf32>
    %210 = vector.shape_cast %209 : vector<32x32xf32> to vector<1x32x32xf32>
    %211 = vector.broadcast %210 : vector<1x32x32xf32> to vector<2x32x32xf32>
    "tpu.trace_start"() <{level = 10 : i32, message = "bth,bhk->btk"}> : () -> ()
    %cst_151 = arith.constant dense<0.000000e+00> : vector<2x8x32xf32>
    %212 = tpu.matmul %202, %205, %cst_151 {dimension_numbers = #tpu.dot_dimension_numbers<[2], [1], [1], [2], [0, 0, 0, 1, 1, 2], [0], [0]>} : vector<2x8x32xf32>, vector<2x32x32xf32>, vector<2x8x32xf32> -> vector<2x8x32xf32>
    "tpu.trace_stop"() : () -> ()
    "tpu.trace_start"() <{level = 10 : i32, message = "btk,bsk->bts"}> : () -> ()
    %cst_152 = arith.constant dense<0.000000e+00> : vector<2x8x8xf32>
    %213 = tpu.matmul %212, %201, %cst_152 {dimension_numbers = #tpu.dot_dimension_numbers<[2], [2], [1], [1], [0, 0, 0, 1, 1, 1], [0], [0]>} : vector<2x8x32xf32>, vector<2x8x32xf32>, vector<2x8x8xf32> -> vector<2x8x8xf32>
    "tpu.trace_stop"() : () -> ()
    %c0_153 = arith.constant 0 : index
    %c0_154 = arith.constant 0 : index
    %c0_155 = arith.constant 0 : index
    %214 = vector.load %arg2[%c0_153, %c0_154, %c0_155] : memref<2x8x8xf32, #tpu.memory_space<vmem>>, vector<2x8x8xf32>
    %215 = arith.addf %213, %214 : vector<2x8x8xf32>
    %cst_156 = arith.constant dense<0xFF800000> : vector<2x8xf32>
    %216 = vector.multi_reduction <maximumf>, %215, %cst_156 [2] : vector<2x8x8xf32> to vector<2x8xf32>
    %217 = vector.shape_cast %216 : vector<2x8xf32> to vector<2x8x1xf32>
    %218 = vector.broadcast %217 : vector<2x8x1xf32> to vector<2x8x8xf32>
    %219 = arith.subf %215, %218 : vector<2x8x8xf32>
    %220 = math.exp %219 : vector<2x8x8xf32>
    %cst_157 = arith.constant dense<0.000000e+00> : vector<2x8xf32>
    %221 = vector.multi_reduction <add>, %220, %cst_157 [2] : vector<2x8x8xf32> to vector<2x8xf32>
    %222 = vector.shape_cast %221 : vector<2x8xf32> to vector<2x8x1xf32>
    %223 = vector.broadcast %222 : vector<2x8x1xf32> to vector<2x8x8xf32>
    %224 = arith.divf %220, %223 : vector<2x8x8xf32>
    "tpu.trace_start"() <{level = 10 : i32, message = "bts,bsh->bth"}> : () -> ()
    %cst_158 = arith.constant dense<0.000000e+00> : vector<2x8x32xf32>
    %225 = tpu.matmul %224, %201, %cst_158 {dimension_numbers = #tpu.dot_dimension_numbers<[2], [1], [1], [2], [0, 0, 0, 1, 1, 2], [0], [0]>} : vector<2x8x8xf32>, vector<2x8x32xf32>, vector<2x8x32xf32> -> vector<2x8x32xf32>
    "tpu.trace_stop"() : () -> ()
    "tpu.trace_start"() <{level = 10 : i32, message = "bth,bhk->btk"}> : () -> ()
    %cst_159 = arith.constant dense<0.000000e+00> : vector<2x8x32xf32>
    %226 = tpu.matmul %225, %208, %cst_159 {dimension_numbers = #tpu.dot_dimension_numbers<[2], [1], [1], [2], [0, 0, 0, 1, 1, 2], [0], [0]>} : vector<2x8x32xf32>, vector<2x32x32xf32>, vector<2x8x32xf32> -> vector<2x8x32xf32>
    %cst_160 = arith.constant dense<0.000000e+00> : vector<2x8x32xf32>
    %227 = tpu.matmul %202, %211, %cst_160 {dimension_numbers = #tpu.dot_dimension_numbers<[2], [1], [1], [2], [0, 0, 0, 1, 1, 2], [0], [0]>} : vector<2x8x32xf32>, vector<2x32x32xf32>, vector<2x8x32xf32> -> vector<2x8x32xf32>
    "tpu.trace_stop"() : () -> ()
    %228 = arith.addf %226, %227 : vector<2x8x32xf32>
    %229 = math.tanh %228 : vector<2x8x32xf32>
    %c0_161 = arith.constant 0 : index
    %c0_162 = arith.constant 0 : index
    %c0_163 = arith.constant 0 : index
    %230 = vector.load %arg12[%c0_161, %c0_162, %c0_163] : memref<2x8x32xf32, #tpu.memory_space<vmem>>, vector<2x8x32xf32>
    tpu.vector_store %arg12[%c0_161, %c0_162, %c0_163], %229 {strides = array<i32>} : memref<2x8x32xf32, #tpu.memory_space<vmem>>, vector<2x8x32xf32>,
    %c0_164 = arith.constant 0 : index
    %c0_165 = arith.constant 0 : index
    %c0_166 = arith.constant 0 : index
    %231 = vector.load %arg13[%c0_164, %c0_165, %c0_166] : memref<2x8x8xf32, #tpu.memory_space<vmem>>, vector<2x8x8xf32>
    tpu.vector_store %arg13[%c0_164, %c0_165, %c0_166], %224 {strides = array<i32>} : memref<2x8x8xf32, #tpu.memory_space<vmem>>, vector<2x8x8xf32>,
    return
  }
}

</mosaic_0001>

<bundles_post_ra>
// kernel: nmt_forward.1
= control target key start
LH: loop header
LB: loop body
LE: loop exit
PB: predicated region body
PF: predicated region fallthrough
CT: control target
= control target key end

     0   :  { %vm65_vm0 = vcmask 130048   ;;  %v1450_v12 = vmov 0.0   ;;  %vm250_vm1 = vcmask 254976   ;;  %vm466_vm2 = vcmask 261120   ;;  %s1860_s3 = inlined_call_operand.vmem [shape: f32[16,32], index: 3, kind: input, shape index: {}]   ;;  %s1861_s0 = inlined_call_operand.vmem [shape: f32[8,2,16], index: 0, kind: input, shape index: {}]   ;;  %s1862_s6 = inlined_call_operand.vmem [shape: f32[16,32], index: 6, kind: input, shape index: {}]   ;;  %s1863_s5 = inlined_call_operand.vmem [shape: f32[1,1,32], index: 5, kind: input, shape index: {}]   ;;  %s1864_s8 = inlined_call_operand.vmem [shape: f32[1,1,32], index: 8, kind: input, shape index: {}]   ;;  %s1865_s1 = inlined_call_operand.vmem [shape: f32[8,2,16], index: 1, kind: input, shape index: {}]   ;;  %s1866_s4 = inlined_call_operand.vmem [shape: f32[32,32], index: 4, kind: input, shape index: {}]   ;;  %s1867_s7 = inlined_call_operand.vmem [shape: f32[32,32], index: 7, kind: input, shape index: {}]   ;;  %s1868_s9 = inlined_call_operand.vmem [shape: f32[32,32], index: 9, kind: input, shape index: {}]   ;;  %s1869_s11 = inlined_call_operand.vmem [shape: f32[32,32], index: 11, kind: input, shape index: {}]   ;;  %s1870_s2 = inlined_call_operand.vmem [shape: f32[2,8,8], index: 2, kind: input, shape index: {}]   ;;  %s1871_s10 = inlined_call_operand.vmem [shape: f32[32,32], index: 10, kind: input, shape index: {}]   ;;  %s1872_s13 = inlined_call_operand.vmem [shape: f32[2,8,8], index: 13, kind: output, shape index: {1}]   ;;  %s1873_s12 = inlined_call_operand.vmem [shape: f32[2,8,32], index: 12, kind: output, shape index: {0}]  }
   0x1   :  { %v60_v0 = vld [vmem:[%s1860_s3 + $0x8] sm:$0xff]  ;;  %v59_v1 = vld [vmem:[%s1860_s3] sm:$0xff]  ;;  %v1555_v7 = vld [vmem:[%s1866_s4 + $0x18] sm:$0xff]  ;;  %vm929_vm3 = vcmask 1041409   ;;  %vm932_vm4 = vcmask 1042434   ;;  %vm935_vm5 = vcmask 1043459  }
   0x2   :  { %83 = vmatpush.msra.mxu0 %v60_v0  ;;  %v51_v2 = vld [vmem:[%s1861_s0] sm:$0x3]  ;;  %106 = vmatpush.msra.mxu1 %v60_v0  ;;  %v1534_v3 = vld [vmem:[%s1862_s6 + $0x8] sm:$0xff]  ;;  %v1561_v8 = vld [vmem:[%s1866_s4 + $0x10] sm:$0xff]  ;;  %vm938_vm6 = vcmask 1044484   ;;  %vm941_vm7 = vcmask 1045509  }
   0x3   :  { %129 = vmatpush.msra.mxu2 %v60_v0  ;;  %152 = vmatpush.msra.mxu3 %v60_v0  ;;  %v1539_v4 = vld [vmem:[%s1862_s6] sm:$0xff]  ;;  %v55_v5 = vld [vmem:[%s1861_s0 + $0x8] sm:$0x3]  ;;  %v56_v14 = vld [vmem:[%s1861_s0 + $0xa] sm:$0x3]  ;;  %vm944_vm8 = vcmask 1046534  }
   0x4   :  { %84 = vmatpush.msra.mxu0 %v59_v1  ;;  %107 = vmatpush.msra.mxu1 %v59_v1  ;;  %v259_v6 = vld [vmem:[%s1865_s1] sm:$0x3]  ;;  %v1567_v9 = vld [vmem:[%s1866_s4 + $0x8] sm:$0xff]  ;;  %v52_v13 = vld [vmem:[%s1861_s0 + $0x2] sm:$0x3]  ;;  %vm947_vm9 = vcmask 1047559  }
   0x5   :  { %1360 = vmatmul.msk.f32.vlgmr.msra.gmra.mxu0 %vm65_vm0, %v51_v2  ;;  %130 = vmatpush.msra.mxu2 %v59_v1  ;;  %v1573_v10 = vld [vmem:[%s1866_s4] sm:$0xff]  ;;  %v263_v11 = vld [vmem:[%s1865_s1 + $0x8] sm:$0x3]  ;;  %v264_v19 = vld [vmem:[%s1865_s1 + $0xa] sm:$0x3]  ;;  %vm1165_vm10 = vcmask 64512  }
   0x6   :  { %198 = vmatpush.msrb.mxu1 %v60_v0  ;;  %175 = vmatpush.msrb.mxu0 %v60_v0  ;;  %v260_v15 = vld [vmem:[%s1865_s1 + $0x2] sm:$0x3]  ;;  %v1605_v16 = vld [vmem:[%s1863_s5] ss:$0 sm:$0xff]  ;;  %v53_v31 = vld [vmem:[%s1861_s0 + $0x4] sm:$0x3] }
   0x7   :  { %221 = vmatpush.msrb.mxu2 %v60_v0  ;;  %153 = vmatpush.msra.mxu3 %v59_v1  ;;  %v1625_v22 = vld [vmem:[%s1864_s8] ss:$0 sm:$0xff]  ;;  %v57_v32 = vld [vmem:[%s1861_s0 + $0xc] sm:$0x3]  ;;  %v261_v33 = vld [vmem:[%s1865_s1 + $0x4] sm:$0x3] }
   0x8   :  { %199 = vmatpush.msrb.mxu1 %v59_v1  ;;  %176 = vmatpush.msrb.mxu0 %v59_v1  ;;  %v265_v42 = vld [vmem:[%s1865_s1 + $0xc] sm:$0x3]  ;;  %v54_v47 = vld [vmem:[%s1861_s0 + $0x6] sm:$0x3]  ;;  %v58_v48 = vld [vmem:[%s1861_s0 + $0xe] sm:$0x3] }
   0x9   :  { %222 = vmatpush.msrb.mxu2 %v59_v1  ;;  %244 = vmatpush.msrb.mxu3 %v60_v0  ;;  %v262_v55 = vld [vmem:[%s1865_s1 + $0x6] sm:$0x3]  ;;  %v266_v58 = vld [vmem:[%s1865_s1 + $0xe] sm:$0x3] }
   0xa   :  { %290 = vmatpush.msra.mxu0 %v1534_v3  ;;  %1361 = vmatmul.msk.f32.vlgmr.msra.gmra.mxu1 %vm65_vm0, %v52_v13 }
   0xb   :  { %245 = vmatpush.msrb.mxu3 %v59_v1  ;;  %313 = vmatpush.msra.mxu1 %v1534_v3 }
   0xc   :  { %291 = vmatpush.msra.mxu0 %v1539_v4  ;;  %1362 = vmatmul.msk.f32.vlgmr.msra.gmra.mxu2 %vm65_vm0, %v53_v31 }
   0xd   :  { %1364 = vmatmul.msk.f32.vlgmr.msrb.gmra.mxu0 %vm65_vm0, %v55_v5  ;;  %314 = vmatpush.msra.mxu1 %v1539_v4 }
   0xe   :  { %382 = vmatpush.msrb.mxu0 %v1534_v3  ;;  %336 = vmatpush.msra.mxu2 %v1534_v3 }
   0xf   :  { %1363 = vmatmul.msk.f32.vlgmr.msra.gmra.mxu3 %vm65_vm0, %v54_v47 }
  0x10   :  { %383 = vmatpush.msrb.mxu0 %v1539_v4  ;;  %337 = vmatpush.msra.mxu2 %v1539_v4 }
  0x11   :  { %359 = vmatpush.msra.mxu3 %v1534_v3 }
  0x12   :  { %1365 = vmatmul.msk.f32.vlgmr.msrb.gmra.mxu1 %vm65_vm0, %v56_v14 }
  0x13   :  { %405 = vmatpush.msrb.mxu1 %v1534_v3  ;;  %360 = vmatpush.msra.mxu3 %v1539_v4 }
  0x14   :  { %1366 = vmatmul.msk.f32.vlgmr.msrb.gmra.mxu2 %vm65_vm0, %v57_v32 }
  0x15   :  { %1368 = vmatmul.msk.f32.vlgmr.msra.gmra.mxu0 %vm65_vm0, %v259_v6  ;;  %406 = vmatpush.msrb.mxu1 %v1539_v4 }
  0x16   :  { %482 = vmatpush.msra.mxu0 %v1555_v7  ;;  %428 = vmatpush.msrb.mxu2 %v1534_v3 }
  0x17   :  { %1367 = vmatmul.msk.f32.vlgmr.msrb.gmra.mxu3 %vm65_vm0, %v58_v48 }
  0x18   :  { %483 = vmatpush.msra.mxu0 %v1561_v8  ;;  %429 = vmatpush.msrb.mxu2 %v1539_v4 }
  0x19   :  { %451 = vmatpush.msrb.mxu3 %v1534_v3 }
  0x1a   :  { %484 = vmatpush.msra.mxu0 %v1567_v9  ;;  %1369 = vmatmul.msk.f32.vlgmr.msra.gmra.mxu1 %vm65_vm0, %v260_v15 }
  0x1b   :  { %510 = vmatpush.msra.mxu1 %v1555_v7  ;;  %452 = vmatpush.msrb.mxu3 %v1539_v4 }
  0x1c   :  { %485 = vmatpush.msra.mxu0 %v1573_v10  ;;  %1370 = vmatmul.msk.f32.vlgmr.msra.gmra.mxu2 %vm65_vm0, %v261_v33 }
  0x1d   :  { %1372 = vmatmul.msk.f32.vlgmr.msrb.gmra.mxu0 %vm65_vm0, %v263_v11  ;;  %511 = vmatpush.msra.mxu1 %v1561_v8 }
  0x1e   :  { %594 = vmatpush.msrb.mxu0 %v1555_v7  ;;  %538 = vmatpush.msra.mxu2 %v1555_v7 }
  0x1f   :  { %512 = vmatpush.msra.mxu1 %v1567_v9  ;;  %1371 = vmatmul.msk.f32.vlgmr.msra.gmra.mxu3 %vm65_vm0, %v262_v55 }
  0x20   :  { %595 = vmatpush.msrb.mxu0 %v1561_v8  ;;  %539 = vmatpush.msra.mxu2 %v1561_v8 }
  0x21   :  { %513 = vmatpush.msra.mxu1 %v1573_v10  ;;  %566 = vmatpush.msra.mxu3 %v1555_v7 }
  0x22   :  { %596 = vmatpush.msrb.mxu0 %v1567_v9  ;;  %1373 = vmatmul.msk.f32.vlgmr.msrb.gmra.mxu1 %vm65_vm0, %v264_v19 }
  0x23   :  { %622 = vmatpush.msrb.mxu1 %v1555_v7  ;;  %540 = vmatpush.msra.mxu2 %v1567_v9 }
  0x24   :  { %597 = vmatpush.msrb.mxu0 %v1573_v10  ;;  %1374 = vmatmul.msk.f32.vlgmr.msrb.gmra.mxu2 %vm65_vm0, %v265_v42 }
  0x25   :  { %486 = vmatmul.f32.vlgmr.msra.gmra.mxu0 %v1450_v12  ;;  %623 = vmatpush.msrb.mxu1 %v1561_v8 }
  0x26   :  { %541 = vmatpush.msra.mxu2 %v1573_v10  ;;  %567 = vmatpush.msra.mxu3 %v1561_v8 }
  0x27   :  { %624 = vmatpush.msrb.mxu1 %v1567_v9  ;;  %1375 = vmatmul.msk.f32.vlgmr.msrb.gmra.mxu3 %vm65_vm0, %v266_v58 }
  0x28   :  { %650 = vmatpush.msrb.mxu2 %v1555_v7  ;;  %568 = vmatpush.msra.mxu3 %v1567_v9 }
  0x29   :  { %625 = vmatpush.msrb.mxu1 %v1573_v10 }
  0x2a   :  { %651 = vmatpush.msrb.mxu2 %v1561_v8  ;;  %569 = vmatpush.msra.mxu3 %v1573_v10 }
  0x2c   :  { %652 = vmatpush.msrb.mxu2 %v1567_v9  ;;  %678 = vmatpush.msrb.mxu3 %v1555_v7 }
  0x2e   :  { %653 = vmatpush.msrb.mxu2 %v1573_v10  ;;  %679 = vmatpush.msrb.mxu3 %v1561_v8 }
  0x30   :  { %680 = vmatpush.msrb.mxu3 %v1567_v9 }
  0x32   :  { %681 = vmatpush.msrb.mxu3 %v1573_v10 }
  0x82   :  { %v86_v17 = vpop.f32.mrf.mxu0 }
  0x83   :  { %v87_v18 = vadd.f32 %v1605_v16, %v86_v17 }
  0x85   :  { %251 = vst.msk [vmem:[#allocation2] sm:$0x3] %vm250_vm1, %v87_v18 }
  0x87   :  { %v109_v34 = vpop.f32.mrf.mxu1 }
  0x88   :  { %v110_v35 = vadd.f32 %v1605_v16, %v109_v34 }
  0x8a   :  { %v178_v20 = vpop.f32.mrf.mxu0  ;;  %252 = vst.msk [vmem:[#allocation2 + $0x2] sm:$0x3] %vm250_vm1, %v110_v35 }
  0x8b   :  { %v179_v21 = vadd.f32 %v1605_v16, %v178_v20 }
  0x8c   :  { %v465_v27 = vld [vmem:[#allocation2] sm:$0x3] }
  0x8d   :  { %255 = vst.msk [vmem:[#allocation2 + $0x8] sm:$0x3] %vm250_vm1, %v179_v21 }
  0x8f   :  { %v201_v36 = vpop.f32.mrf.mxu1  ;;  %v132_v49 = vpop.f32.mrf.mxu2 }
  0x90   :  { %v202_v37 = vadd.f32 %v1605_v16, %v201_v36  ;;  %v133_v50 = vadd.f32 %v1605_v16, %v132_v49 }
  0x91   :  { %v494_v43 = vld [vmem:[#allocation2 + $0x2] sm:$0x3] }
  0x92   :  { %v293_v23 = vpop.f32.mrf.mxu0  ;;  %256 = vst.msk [vmem:[#allocation2 + $0xa] sm:$0x3] %vm250_vm1, %v202_v37  ;;  %v155_v63 = vpop.f32.mrf.mxu3 }
  0x93   :  { %v294_v24 = vadd.f32 %v1625_v22, %v293_v23  ;;  %253 = vst.msk [vmem:[#allocation2 + $0x4] sm:$0x3] %vm250_vm1, %v133_v50  ;;  %v156_v0 = vadd.f32 %v1605_v16, %v155_v63  ;;  %v50_v23 = vld [vmem:[%s1867_s7 + $0x18] sm:$0xff] }
  0x94   :  { %v578_v11 = vld [vmem:[#allocation2 + $0x8] sm:$0x3]  ;;  %705 = vmatpush.msra.mxu0 %v50_v23 }
  0x95   :  { %457 = vst.msk [vmem:[#allocation3] sm:$0x3] %vm250_vm1, %v294_v24  ;;  %v49_v24 = vld [vmem:[%s1867_s7 + $0x10] sm:$0xff] }
  0x96   :  { %254 = vst.msk [vmem:[#allocation2 + $0x6] sm:$0x3] %vm250_vm1, %v156_v0  ;;  %706 = vmatpush.msra.mxu0 %v49_v24 }
  0x97   :  { %v316_v38 = vpop.f32.mrf.mxu1  ;;  %v224_v51 = vpop.f32.mrf.mxu2 }
  0x98   :  { %v317_v39 = vadd.f32 %v1625_v22, %v316_v38  ;;  %v225_v52 = vadd.f32 %v1605_v16, %v224_v51 }
  0x99   :  { %v606_v15 = vld [vmem:[#allocation2 + $0xa] sm:$0x3] }
  0x9a   :  { %v385_v25 = vpop.f32.mrf.mxu0  ;;  %458 = vst.msk [vmem:[#allocation3 + $0x2] sm:$0x3] %vm250_vm1, %v317_v39  ;;  %v522_v59 = vld [vmem:[#allocation2 + $0x4] sm:$0x3]  ;;  %v247_v1 = vpop.f32.mrf.mxu3 }
  0x9b   :  { %v386_v26 = vadd.f32 %v1625_v22, %v385_v25  ;;  %257 = vst.msk [vmem:[#allocation2 + $0xc] sm:$0x3] %vm250_vm1, %v225_v52  ;;  %v248_v2 = vadd.f32 %v1605_v16, %v247_v1  ;;  %v48_v25 = vld [vmem:[%s1867_s7 + $0x8] sm:$0xff] }
  0x9c   :  { %707 = vmatpush.msra.mxu0 %v48_v25 }
  0x9d   :  { %461 = vst.msk [vmem:[#allocation3 + $0x8] sm:$0x3] %vm250_vm1, %v386_v26  ;;  %v550_v7 = vld [vmem:[#allocation2 + $0x6] sm:$0x3] }
  0x9e   :  { %258 = vst.msk [vmem:[#allocation2 + $0xe] sm:$0x3] %vm250_vm1, %v248_v2  ;;  %v47_v26 = vld [vmem:[%s1867_s7] sm:$0xff] }
  0x9f   :  { %v408_v40 = vpop.f32.mrf.mxu1  ;;  %v339_v53 = vpop.f32.mrf.mxu2  ;;  %708 = vmatpush.msra.mxu0 %v47_v26 }
  0xa0   :  { %v409_v41 = vadd.f32 %v1625_v22, %v408_v40  ;;  %v340_v54 = vadd.f32 %v1625_v22, %v339_v53 }
  0xa2   :  { %v487_v28 = vpop.f32.mrf.mxu0  ;;  %462 = vst.msk [vmem:[#allocation3 + $0xa] sm:$0x3] %vm250_vm1, %v409_v41  ;;  %v362_v3 = vpop.f32.mrf.mxu3  ;;  %v634_v19 = vld [vmem:[#allocation2 + $0xc] sm:$0x3] }
  0xa3   :  { %v490_v29 = vadd.f32 %v487_v28, %v465_v27  ;;  %459 = vst.msk [vmem:[#allocation3 + $0x4] sm:$0x3] %vm250_vm1, %v340_v54  ;;  %v363_v4 = vadd.f32 %v1625_v22, %v362_v3 }
  0xa5   :  { %1406 = vtanh.f32 %v490_v29  ;;  %460 = vst.msk [vmem:[#allocation3 + $0x6] sm:$0x3] %vm250_vm1, %v363_v4  ;;  %v662_v27 = vld [vmem:[#allocation2 + $0xe] sm:$0x3] }
  0xa7   :  { %v431_v56 = vpop.f32.mrf.mxu2 }
  0xa8   :  { %v432_v57 = vadd.f32 %v1625_v22, %v431_v56 }
  0xaa   :  { %463 = vst.msk [vmem:[#allocation3 + $0xc] sm:$0x3] %vm250_vm1, %v432_v57  ;;  %v454_v5 = vpop.f32.mrf.mxu3 }
  0xab   :  { %v1407_v30 = vpop.eup %1406  ;;  %v455_v6 = vadd.f32 %v1625_v22, %v454_v5 }
  0xac   :  { %492 = vst.msk [vmem:[#allocation2] sm:$0x3] %vm250_vm1, %v1407_v30  ;;  %1376 = vmatmul.msk.f32.vlgmr.msra.gmra.mxu1 %vm466_vm2, %v1407_v30 }
  0xad   :  { %464 = vst.msk [vmem:[#allocation3 + $0xe] sm:$0x3] %vm250_vm1, %v455_v6  ;;  %733 = vmatpush.msra.mxu1 %v50_v23 }
  0xaf   :  { %734 = vmatpush.msra.mxu1 %v49_v24 }
  0xb1   :  { %735 = vmatpush.msra.mxu1 %v48_v25 }
  0xb3   :  { %736 = vmatpush.msra.mxu1 %v47_v26  ;;  %v912_v36 = vld [vmem:[#allocation2] sm:$0x1]  ;;  %v983_v41 = vld [vmem:[#allocation2 + $0x1] sm:$0x1] }
 0x129   :  { %v515_v44 = vpop.f32.mrf.mxu1 }
 0x12a   :  { %v518_v45 = vadd.f32 %v515_v44, %v494_v43 }
 0x12c   :  { %1408 = vtanh.f32 %v518_v45 }
 0x132   :  { %v1409_v46 = vpop.eup %1408 }
 0x133   :  { %520 = vst.msk [vmem:[#allocation2 + $0x2] sm:$0x3] %vm250_vm1, %v1409_v46  ;;  %1377 = vmatmul.msk.f32.vlgmr.msra.gmra.mxu2 %vm466_vm2, %v1409_v46 }
 0x134   :  { %761 = vmatpush.msra.mxu2 %v50_v23 }
 0x136   :  { %762 = vmatpush.msra.mxu2 %v49_v24 }
 0x138   :  { %763 = vmatpush.msra.mxu2 %v48_v25 }
 0x13a   :  { %764 = vmatpush.msra.mxu2 %v47_v26  ;;  %v913_v30 = vld [vmem:[#allocation2 + $0x2] sm:$0x1]  ;;  %v984_v31 = vld [vmem:[#allocation2 + $0x3] sm:$0x1] }
 0x13b   :  { %v928_v33 = vrot.slane %v913_v30, 7  ;;  %v999_v37 = vrot.slane %v984_v31, 7 }
 0x13d   :  { %v930_v47 = vsel %vm929_vm3, %v928_v33, %v912_v36  ;;  %v1000_v52 = vsel %vm929_vm3, %v999_v37, %v983_v41  ;;  %v801_v33 = vld [vmem:[#allocation3 + $0x8] sm:$0x3]  ;;  %v829_v37 = vld [vmem:[#allocation3 + $0xa] sm:$0x3]  ;;  %v857_v41 = vld [vmem:[#allocation3 + $0xc] sm:$0x3] }
 0x1b6   :  { %v543_v60 = vpop.f32.mrf.mxu2 }
 0x1b7   :  { %v546_v61 = vadd.f32 %v543_v60, %v522_v59 }
 0x1b9   :  { %1410 = vtanh.f32 %v546_v61 }
 0x1bf   :  { %v1411_v62 = vpop.eup %1410 }
 0x1c0   :  { %548 = vst.msk [vmem:[#allocation2 + $0x4] sm:$0x3] %vm250_vm1, %v1411_v62  ;;  %1378 = vmatmul.msk.f32.vlgmr.msra.gmra.mxu3 %vm466_vm2, %v1411_v62 }
 0x1c1   :  { %789 = vmatpush.msra.mxu3 %v50_v23 }
 0x1c3   :  { %790 = vmatpush.msra.mxu3 %v49_v24 }
 0x1c5   :  { %791 = vmatpush.msra.mxu3 %v48_v25 }
 0x1c7   :  { %792 = vmatpush.msra.mxu3 %v47_v26  ;;  %v914_v32 = vld [vmem:[#allocation2 + $0x4] sm:$0x1]  ;;  %v985_v34 = vld [vmem:[#allocation2 + $0x5] sm:$0x1] }
 0x1c8   :  { %v931_v38 = vrot.slane %v914_v32, 6  ;;  %v1001_v44 = vrot.slane %v985_v34, 6 }
 0x1ca   :  { %v933_v55 = vsel %vm932_vm4, %v931_v38, %v930_v47  ;;  %v1002_v58 = vsel %vm932_vm4, %v1001_v44, %v1000_v52 }
 0x243   :  { %v571_v8 = vpop.f32.mrf.mxu3 }
 0x244   :  { %v574_v9 = vadd.f32 %v571_v8, %v550_v7 }
 0x246   :  { %1412 = vtanh.f32 %v574_v9 }
 0x24c   :  { %v1413_v10 = vpop.eup %1412 }
 0x24d   :  { %576 = vst.msk [vmem:[#allocation2 + $0x6] sm:$0x3] %vm250_vm1, %v1413_v10  ;;  %1379 = vmatmul.msk.f32.vlgmr.msrb.gmra.mxu0 %vm466_vm2, %v1413_v10 }
 0x24e   :  { %817 = vmatpush.msrb.mxu0 %v50_v23 }
 0x250   :  { %818 = vmatpush.msrb.mxu0 %v49_v24 }
 0x252   :  { %819 = vmatpush.msrb.mxu0 %v48_v25 }
 0x254   :  { %820 = vmatpush.msrb.mxu0 %v47_v26  ;;  %v915_v39 = vld [vmem:[#allocation2 + $0x6] sm:$0x1]  ;;  %v986_v40 = vld [vmem:[#allocation2 + $0x7] sm:$0x1] }
 0x255   :  { %v934_v48 = vrot.slane %v915_v39, 5  ;;  %v1003_v49 = vrot.slane %v986_v40, 5 }
 0x257   :  { %v936_v61 = vsel %vm935_vm5, %v934_v48, %v933_v55  ;;  %v1004_v62 = vsel %vm935_vm5, %v1003_v49, %v1002_v58 }
 0x2ca   :  { %v599_v12 = vpop.f32.mrf.mxu0 }
 0x2cb   :  { %v602_v13 = vadd.f32 %v599_v12, %v578_v11  ;;  %v689_v11 = vld [vmem:[#allocation3] sm:$0x3] }
 0x2cd   :  { %1414 = vtanh.f32 %v602_v13 }
 0x2d3   :  { %v1415_v14 = vpop.eup %1414 }
 0x2d4   :  { %604 = vst.msk [vmem:[#allocation2 + $0x8] sm:$0x3] %vm250_vm1, %v1415_v14  ;;  %1380 = vmatmul.msk.f32.vlgmr.msrb.gmra.mxu1 %vm466_vm2, %v1415_v14 }
 0x2d5   :  { %845 = vmatpush.msrb.mxu1 %v50_v23 }
 0x2d7   :  { %846 = vmatpush.msrb.mxu1 %v49_v24 }
 0x2d9   :  { %847 = vmatpush.msrb.mxu1 %v48_v25 }
 0x2db   :  { %848 = vmatpush.msrb.mxu1 %v47_v26  ;;  %v916_v42 = vld [vmem:[#allocation2 + $0x8] sm:$0x1]  ;;  %v987_v43 = vld [vmem:[#allocation2 + $0x9] sm:$0x1] }
 0x2dc   :  { %v937_v53 = vrot.slane %v916_v42, 4  ;;  %v1005_v54 = vrot.slane %v987_v43, 4 }
 0x2de   :  { %v939_v63 = vsel %vm938_vm6, %v937_v53, %v936_v61  ;;  %v1006_v0 = vsel %vm938_vm6, %v1005_v54, %v1004_v62 }
 0x351   :  { %v627_v16 = vpop.f32.mrf.mxu1 }
 0x352   :  { %v630_v17 = vadd.f32 %v627_v16, %v606_v15  ;;  %v717_v15 = vld [vmem:[#allocation3 + $0x2] sm:$0x3] }
 0x354   :  { %1416 = vtanh.f32 %v630_v17 }
 0x35a   :  { %v1417_v18 = vpop.eup %1416 }
 0x35b   :  { %632 = vst.msk [vmem:[#allocation2 + $0xa] sm:$0x3] %vm250_vm1, %v1417_v18  ;;  %1381 = vmatmul.msk.f32.vlgmr.msrb.gmra.mxu2 %vm466_vm2, %v1417_v18 }
 0x35c   :  { %873 = vmatpush.msrb.mxu2 %v50_v23 }
 0x35e   :  { %874 = vmatpush.msrb.mxu2 %v49_v24 }
 0x360   :  { %875 = vmatpush.msrb.mxu2 %v48_v25 }
 0x362   :  { %876 = vmatpush.msrb.mxu2 %v47_v26  ;;  %v917_v45 = vld [vmem:[#allocation2 + $0xa] sm:$0x1]  ;;  %v988_v46 = vld [vmem:[#allocation2 + $0xb] sm:$0x1] }
 0x363   :  { %v940_v56 = vrot.slane %v917_v45, 3  ;;  %v1007_v57 = vrot.slane %v988_v46, 3  ;;  %v885_v45 = vld [vmem:[#allocation3 + $0xe] sm:$0x3] }
 0x365   :  { %v942_v3 = vsel %vm941_vm7, %v940_v56, %v939_v63  ;;  %v1008_v4 = vsel %vm941_vm7, %v1007_v57, %v1006_v0 }
 0x3de   :  { %v655_v20 = vpop.f32.mrf.mxu2 }
 0x3df   :  { %v658_v21 = vadd.f32 %v655_v20, %v634_v19  ;;  %v745_v20 = vld [vmem:[#allocation3 + $0x4] sm:$0x3] }
 0x3e1   :  { %1418 = vtanh.f32 %v658_v21 }
 0x3e7   :  { %v1419_v22 = vpop.eup %1418 }
 0x3e8   :  { %660 = vst.msk [vmem:[#allocation2 + $0xc] sm:$0x3] %vm250_vm1, %v1419_v22  ;;  %1382 = vmatmul.msk.f32.vlgmr.msrb.gmra.mxu3 %vm466_vm2, %v1419_v22 }
 0x3e9   :  { %901 = vmatpush.msrb.mxu3 %v50_v23 }
 0x3eb   :  { %902 = vmatpush.msrb.mxu3 %v49_v24 }
 0x3ed   :  { %903 = vmatpush.msrb.mxu3 %v48_v25  ;;  %v1056_v25 = vld [vmem:[%s1868_s9 + $0x18] sm:$0xff] }
 0x3ef   :  { %904 = vmatpush.msrb.mxu3 %v47_v26  ;;  %v918_v50 = vld [vmem:[#allocation2 + $0xc] sm:$0x1]  ;;  %v989_v51 = vld [vmem:[#allocation2 + $0xd] sm:$0x1]  ;;  %v1055_v26 = vld [vmem:[%s1868_s9 + $0x10] sm:$0xff] }
 0x3f0   :  { %v943_v59 = vrot.slane %v918_v50, 2  ;;  %v1009_v60 = vrot.slane %v989_v51, 2 }
 0x3f2   :  { %v945_v7 = vsel %vm944_vm8, %v943_v59, %v942_v3  ;;  %v1010_v8 = vsel %vm944_vm8, %v1009_v60, %v1008_v4 }
 0x46b   :  { %v683_v28 = vpop.f32.mrf.mxu3 }
 0x46c   :  { %v686_v29 = vadd.f32 %v683_v28, %v662_v27  ;;  %v1054_v27 = vld [vmem:[%s1868_s9 + $0x8] sm:$0xff]  ;;  %v1053_v28 = vld [vmem:[%s1868_s9] sm:$0xff] }
 0x46e   :  { %1420 = vtanh.f32 %v686_v29  ;;  %v773_v29 = vld [vmem:[#allocation3 + $0x6] sm:$0x3] }
 0x474   :  { %v1421_v35 = vpop.eup %1420 }
 0x475   :  { %688 = vst.msk [vmem:[#allocation2 + $0xe] sm:$0x3] %vm250_vm1, %v1421_v35  ;;  %1383 = vmatmul.msk.f32.vlgmr.msra.gmra.mxu0 %vm466_vm2, %v1421_v35 }
 0x476   :  { %1080 = vmatpush.msra.mxu0 %v1056_v25 }
 0x478   :  { %1081 = vmatpush.msra.mxu0 %v1055_v26 }
 0x47a   :  { %1082 = vmatpush.msra.mxu0 %v1054_v27 }
 0x47c   :  { %v919_v1 = vld [vmem:[#allocation2 + $0xe] sm:$0x1]  ;;  %v990_v2 = vld [vmem:[#allocation2 + $0xf] sm:$0x1]  ;;  %1083 = vmatpush.msra.mxu0 %v1053_v28 }
 0x47d   :  { %v946_v5 = vrot.slane %v919_v1, 1  ;;  %v1011_v6 = vrot.slane %v990_v2, 1 }
 0x47f   :  { %v948_v9 = vsel %vm947_vm9, %v946_v5, %v945_v7  ;;  %v1012_v10 = vsel %vm947_vm9, %v1011_v6, %v1010_v8 }
 0x480   :  { %950 = vst.msk [vmem:[#allocation4] sm:$0xff] %vm466_vm2, %v948_v9 }
 0x481   :  { %1015 = vst.msk [vmem:[#allocation4 + $0x8] sm:$0xff] %vm466_vm2, %v1012_v10 }
 0x487   :  { %v1049_v19 = vld [vmem:[#allocation4] sm:$0xff] }
 0x488   :  { %v1050_v24 = vld [vmem:[#allocation4 + $0x8] sm:$0xff] }
 0x4f2   :  { %v710_v12 = vpop.f32.mrf.mxu0 }
 0x4f3   :  { %v713_v13 = vadd.f32 %v710_v12, %v689_v11 }
 0x4f5   :  { %1422 = vtanh.f32 %v713_v13 }
 0x4fb   :  { %v1423_v14 = vpop.eup %1422 }
 0x4fc   :  { %715 = vst.msk [vmem:[#allocation3] sm:$0x3] %vm250_vm1, %v1423_v14  ;;  %1384 = vmatmul.msk.f32.vlgmr.msra.gmra.mxu1 %vm466_vm2, %v1423_v14 }
 0x4fd   :  { %1103 = vmatpush.msra.mxu1 %v1056_v25 }
 0x4ff   :  { %1104 = vmatpush.msra.mxu1 %v1055_v26 }
 0x501   :  { %1105 = vmatpush.msra.mxu1 %v1054_v27 }
 0x503   :  { %1106 = vmatpush.msra.mxu1 %v1053_v28  ;;  %v951_v3 = vld [vmem:[#allocation3] sm:$0x1]  ;;  %v1016_v4 = vld [vmem:[#allocation3 + $0x1] sm:$0x1] }
 0x579   :  { %v738_v16 = vpop.f32.mrf.mxu1 }
 0x57a   :  { %v741_v17 = vadd.f32 %v738_v16, %v717_v15 }
 0x57c   :  { %1424 = vtanh.f32 %v741_v17 }
 0x582   :  { %v1425_v18 = vpop.eup %1424 }
 0x583   :  { %743 = vst.msk [vmem:[#allocation3 + $0x2] sm:$0x3] %vm250_vm1, %v1425_v18  ;;  %1385 = vmatmul.msk.f32.vlgmr.msra.gmra.mxu2 %vm466_vm2, %v1425_v18 }
 0x584   :  { %1393 = vmatpush.xpose.msk.msra.mxu2 %vm466_vm2, %v1049_v19 }
 0x58a   :  { %v952_v48 = vld [vmem:[#allocation3 + $0x2] sm:$0x1]  ;;  %v1017_v49 = vld [vmem:[#allocation3 + $0x3] sm:$0x1] }
 0x58b   :  { %v967_v53 = vrot.slane %v952_v48, 7  ;;  %v1032_v54 = vrot.slane %v1017_v49, 7 }
 0x58d   :  { %v968_v7 = vsel %vm929_vm3, %v967_v53, %v951_v3  ;;  %v1033_v8 = vsel %vm929_vm3, %v1032_v54, %v1016_v4 }
 0x606   :  { %v766_v21 = vpop.f32.mrf.mxu2 }
 0x607   :  { %v769_v22 = vadd.f32 %v766_v21, %v745_v20 }
 0x609   :  { %1426 = vtanh.f32 %v769_v22 }
 0x60f   :  { %v1427_v23 = vpop.eup %1426 }
 0x610   :  { %771 = vst.msk [vmem:[#allocation3 + $0x4] sm:$0x3] %vm250_vm1, %v1427_v23  ;;  %1386 = vmatmul.msk.f32.vlgmr.msra.gmra.mxu3 %vm466_vm2, %v1427_v23 }
 0x611   :  { %1395 = vmatpush.xpose.msk.msra.mxu3 %vm466_vm2, %v1050_v24 }
 0x617   :  { %v953_v50 = vld [vmem:[#allocation3 + $0x4] sm:$0x1]  ;;  %v1018_v51 = vld [vmem:[#allocation3 + $0x5] sm:$0x1] }
 0x618   :  { %v969_v59 = vrot.slane %v953_v50, 6  ;;  %v1034_v60 = vrot.slane %v1018_v51, 6 }
 0x61a   :  { %v970_v11 = vsel %vm932_vm4, %v969_v59, %v968_v7  ;;  %v1035_v12 = vsel %vm932_vm4, %v1034_v60, %v1033_v8 }
 0x693   :  { %v794_v30 = vpop.f32.mrf.mxu3 }
 0x694   :  { %v797_v31 = vadd.f32 %v794_v30, %v773_v29 }
 0x696   :  { %1428 = vtanh.f32 %v797_v31  ;;  %v1064_v31 = vld [vmem:[%s1869_s11 + $0x18] sm:$0xff] }
 0x69c   :  { %v1429_v32 = vpop.eup %1428 }
 0x69d   :  { %799 = vst.msk [vmem:[#allocation3 + $0x6] sm:$0x3] %vm250_vm1, %v1429_v32  ;;  %1387 = vmatmul.msk.f32.vlgmr.msrb.gmra.mxu0 %vm466_vm2, %v1429_v32  ;;  %v1063_v32 = vld [vmem:[%s1869_s11 + $0x10] sm:$0xff] }
 0x69e   :  { %1232 = vmatpush.msrb.mxu0 %v1049_v19 }
 0x6a4   :  { %v954_v55 = vld [vmem:[#allocation3 + $0x6] sm:$0x1]  ;;  %v1019_v56 = vld [vmem:[#allocation3 + $0x7] sm:$0x1] }
 0x6a5   :  { %v971_v63 = vrot.slane %v954_v55, 5  ;;  %v1036_v0 = vrot.slane %v1019_v56, 5  ;;  %v1060_v55 = vld [vmem:[%s1871_s10 + $0x18] sm:$0xff]  ;;  %v1059_v56 = vld [vmem:[%s1871_s10 + $0x10] sm:$0xff] }
 0x6a7   :  { %v972_v15 = vsel %vm935_vm5, %v971_v63, %v970_v11  ;;  %v1037_v16 = vsel %vm935_vm5, %v1036_v0, %v1035_v12 }
 0x71a   :  { %v822_v34 = vpop.f32.mrf.mxu0 }
 0x71b   :  { %v825_v35 = vadd.f32 %v822_v34, %v801_v33  ;;  %v1062_v33 = vld [vmem:[%s1869_s11 + $0x8] sm:$0xff]  ;;  %v1061_v34 = vld [vmem:[%s1869_s11] sm:$0xff] }
 0x71d   :  { %1430 = vtanh.f32 %v825_v35 }
 0x723   :  { %v1431_v36 = vpop.eup %1430 }
 0x724   :  { %827 = vst.msk [vmem:[#allocation3 + $0x8] sm:$0x3] %vm250_vm1, %v1431_v36  ;;  %1388 = vmatmul.msk.f32.vlgmr.msrb.gmra.mxu1 %vm466_vm2, %v1431_v36 }
 0x725   :  { %1255 = vmatpush.msrb.mxu1 %v1050_v24 }
 0x72b   :  { %v955_v57 = vld [vmem:[#allocation3 + $0x8] sm:$0x1]  ;;  %v1020_v58 = vld [vmem:[#allocation3 + $0x9] sm:$0x1] }
 0x72c   :  { %v973_v5 = vrot.slane %v955_v57, 4  ;;  %v1038_v6 = vrot.slane %v1020_v58, 4  ;;  %v1058_v57 = vld [vmem:[%s1871_s10 + $0x8] sm:$0xff] }
 0x72e   :  { %v974_v17 = vsel %vm938_vm6, %v973_v5, %v972_v15  ;;  %v1039_v18 = vsel %vm938_vm6, %v1038_v6, %v1037_v16 }
 0x7a1   :  { %v850_v38 = vpop.f32.mrf.mxu1 }
 0x7a2   :  { %v853_v39 = vadd.f32 %v850_v38, %v829_v37  ;;  %v1111_v37 = vld [vmem:[%s1870_s2] sm:$0xff] }
 0x7a4   :  { %1432 = vtanh.f32 %v853_v39 }
 0x7aa   :  { %v1433_v40 = vpop.eup %1432 }
 0x7ab   :  { %855 = vst.msk [vmem:[#allocation3 + $0xa] sm:$0x3] %vm250_vm1, %v1433_v40  ;;  %1389 = vmatmul.msk.f32.vlgmr.msrb.gmra.mxu2 %vm466_vm2, %v1433_v40 }
 0x7ac   :  { %1272 = vmatpush.msrb.mxu2 %v1064_v31 }
 0x7ae   :  { %1273 = vmatpush.msrb.mxu2 %v1063_v32 }
 0x7b0   :  { %1274 = vmatpush.msrb.mxu2 %v1062_v33 }
 0x7b2   :  { %v956_v61 = vld [vmem:[#allocation3 + $0xa] sm:$0x1]  ;;  %v1021_v62 = vld [vmem:[#allocation3 + $0xb] sm:$0x1]  ;;  %1275 = vmatpush.msrb.mxu2 %v1061_v34 }
 0x7b3   :  { %v975_v9 = vrot.slane %v956_v61, 3  ;;  %v1040_v10 = vrot.slane %v1021_v62, 3 }
 0x7b5   :  { %v976_v21 = vsel %vm941_vm7, %v975_v9, %v974_v17  ;;  %v1041_v22 = vsel %vm941_vm7, %v1040_v10, %v1039_v18  ;;  %v1057_v18 = vld [vmem:[%s1871_s10] sm:$0xff] }
 0x82e   :  { %v878_v42 = vpop.f32.mrf.mxu2 }
 0x82f   :  { %v881_v43 = vadd.f32 %v878_v42, %v857_v41  ;;  %v1112_v41 = vld [vmem:[%s1870_s2 + $0x8] sm:$0xff] }
 0x831   :  { %1434 = vtanh.f32 %v881_v43 }
 0x837   :  { %v1435_v44 = vpop.eup %1434 }
 0x838   :  { %883 = vst.msk [vmem:[#allocation3 + $0xc] sm:$0x3] %vm250_vm1, %v1435_v44  ;;  %1390 = vmatmul.msk.f32.vlgmr.msrb.gmra.mxu3 %vm466_vm2, %v1435_v44 }
 0x839   :  { %1292 = vmatpush.msrb.mxu3 %v1064_v31 }
 0x83b   :  { %1293 = vmatpush.msrb.mxu3 %v1063_v32 }
 0x83d   :  { %1294 = vmatpush.msrb.mxu3 %v1062_v33 }
 0x83f   :  { %v957_v1 = vld [vmem:[#allocation3 + $0xc] sm:$0x1]  ;;  %v1022_v2 = vld [vmem:[#allocation3 + $0xd] sm:$0x1]  ;;  %1295 = vmatpush.msrb.mxu3 %v1061_v34 }
 0x840   :  { %v977_v13 = vrot.slane %v957_v1, 2  ;;  %v1042_v14 = vrot.slane %v1022_v2, 2 }
 0x842   :  { %v978_v25 = vsel %vm944_vm8, %v977_v13, %v976_v21  ;;  %v1043_v26 = vsel %vm944_vm8, %v1042_v14, %v1041_v22 }
 0x8bb   :  { %v906_v46 = vpop.f32.mrf.mxu3 }
 0x8bc   :  { %v909_v47 = vadd.f32 %v906_v46, %v885_v45 }
 0x8be   :  { %1436 = vtanh.f32 %v909_v47 }
 0x8c4   :  { %v1437_v52 = vpop.eup %1436 }
 0x8c5   :  { %911 = vst.msk [vmem:[#allocation3 + $0xe] sm:$0x3] %vm250_vm1, %v1437_v52 }
 0x8cc   :  { %v958_v19 = vld [vmem:[#allocation3 + $0xe] sm:$0x1]  ;;  %v1023_v20 = vld [vmem:[#allocation3 + $0xf] sm:$0x1] }
 0x8cd   :  { %v979_v23 = vrot.slane %v958_v19, 1  ;;  %v1044_v24 = vrot.slane %v1023_v20, 1 }
 0x8cf   :  { %v980_v27 = vsel %vm947_vm9, %v979_v23, %v978_v25  ;;  %v1045_v28 = vsel %vm947_vm9, %v1044_v24, %v1043_v26 }
 0x8d0   :  { %982 = vst.msk [vmem:[#allocation5] sm:$0xff] %vm466_vm2, %v980_v27 }
 0x8d1   :  { %1048 = vst.msk [vmem:[#allocation5 + $0x8] sm:$0xff] %vm466_vm2, %v1045_v28 }
 0x8d7   :  { %v1051_v29 = vld [vmem:[#allocation5] sm:$0xff] }
 0x8d8   :  { %1391 = vmatmul.msk.f32.vlgmr.msra.gmra.mxu0 %vm466_vm2, %v1051_v29  ;;  %v1052_v30 = vld [vmem:[#allocation5 + $0x8] sm:$0xff] }
 0x8d9   :  { %1392 = vmatmul.msk.f32.vlgmr.msra.gmra.mxu1 %vm466_vm2, %v1052_v30  ;;  %1315 = vmatpush.msra.mxu0 %v1060_v55 }
 0x8da   :  { %1338 = vmatpush.msra.mxu1 %v1060_v55 }
 0x8db   :  { %1316 = vmatpush.msra.mxu0 %v1059_v56 }
 0x8dc   :  { %1339 = vmatpush.msra.mxu1 %v1059_v56 }
 0x8dd   :  { %1317 = vmatpush.msra.mxu0 %v1058_v57 }
 0x8de   :  { %1340 = vmatpush.msra.mxu1 %v1058_v57 }
 0x8df   :  { %1318 = vmatpush.msra.mxu0 %v1057_v18 }
 0x8e0   :  { %1341 = vmatpush.msra.mxu1 %v1057_v18 }
 0x955   :  { %v1085_v35 = vpop.f32.mrf.mxu0 }
 0x956   :  { %v1108_v36 = vpop.f32.mrf.mxu1  ;;  %1394 = vmatmul.msk.f32.vlgmr.msra.gmra.mxu2 %vm466_vm2, %v1085_v35 }
 0x957   :  { %1396 = vmatmul.msk.f32.vlgmr.msra.gmra.mxu3 %vm466_vm2, %v1108_v36 }
 0x95e   :  { %1399 = vmatmul.msk.f32.vlgmr.msrb.gmra.mxu2 %vm466_vm2, %v1051_v29 }
 0x95f   :  { %1400 = vmatmul.msk.f32.vlgmr.msrb.gmra.mxu3 %vm466_vm2, %v1052_v30 }
 0x9d9   :  { %v1136_v38 = vpop.f32.mrf.mxu2 }
 0x9da   :  { %v1137_v39 = vadd.f32 %v1136_v38, %v1111_v37  ;;  %v1162_v42 = vpop.f32.mrf.mxu3 }
 0x9db   :  { %v1163_v43 = vadd.f32 %v1162_v42, %v1112_v41 }
 0x9dc   :  { %v1166_v40 = vsel %vm1165_vm10, %v1137_v39, -inf }
 0x9dd   :  { %1167 = vmax.xlane.f32.xlu0 %v1166_v40  ;;  %v1169_v44 = vsel %vm1165_vm10, %v1163_v43, -inf }
 0x9e1   :  { %v1277_v21 = vpop.f32.mrf.mxu2 }
 0x9e2   :  { %v1297_v24 = vpop.f32.mrf.mxu3 }
 0x9e5   :  { %1170 = vmax.xlane.f32.xlu0 %v1169_v44 }
 0xa50   :  { %v1168_v45 = vpop.xlane.xlu0 %1167 }
 0xa51   :  { %v1172_v46 = vsub.f32 %v1137_v39, %v1168_v45 }
 0xa53   :  { %v1174_v47 = vmul.f32 1.442695, %v1172_v46 }
 0xa55   :  { %1438 = vpow2.f32 %v1174_v47 }
 0xa58   :  { %v1171_v48 = vpop.xlane.xlu0 %1170 }
 0xa59   :  { %v1173_v49 = vsub.f32 %v1163_v43, %v1171_v48 }
 0xa5b   :  { %v1439_v50 = vpop.eup %1438  ;;  %v1176_v51 = vmul.f32 1.442695, %v1173_v49 }
 0xa5c   :  { %v1178_v52 = vsel %vm1165_vm10, %v1439_v50, 0.0 }
 0xa5d   :  { %1440 = vpow2.f32 %v1176_v51  ;;  %1179 = vadd.xlane.f32.xlu1 %v1178_v52 }
 0xa63   :  { %v1441_v53 = vpop.eup %1440 }
 0xa64   :  { %v1181_v54 = vsel %vm1165_vm10, %v1441_v53, 0.0 }
 0xa65   :  { %1182 = vadd.xlane.f32.xlu1 %v1181_v54 }
 0xad0   :  { %v1180_v58 = vpop.xlane.xlu1 %1179 }
 0xad1   :  { %1442 = vrcp.f32 %v1180_v58  ;;  %v1195_v63 = vand.u32 2147483648, %v1180_v58  ;;  %v1193_v1 = vand.u32 2147483647, %v1180_v58  ;;  %vm1189_vm12 = vweird.f32 %v1180_v58 }
 0xad3   :  { %v1196_v4 = vor.u32 1.1754944e-38, %v1195_v63  ;;  %vm1194_vm14 = vcmp.eq.f32.partialorder %v1193_v1, 8.507059e+37 }
 0xad7   :  { %v1443_v59 = vpop.eup %1442 }
 0xad8   :  { %v1185_v60 = vmul.f32 %v1443_v59, %v1180_v58  ;;  %v1183_v61 = vpop.xlane.xlu1 %1182  ;;  %vm1190_vm11 = vweird.f32 %v1443_v59 }
 0xad9   :  { %1444 = vrcp.f32 %v1183_v61  ;;  %vm1191_vm13 = vmor %vm1189_vm12, %vm1190_vm11  ;;  %v1210_v10 = vand.u32 2147483648, %v1183_v61  ;;  %v1208_v12 = vand.u32 2147483647, %v1183_v61  ;;  %vm1204_vm0 = vweird.f32 %v1183_v61 }
 0xada   :  { %v1186_v62 = vsub.f32 1.0, %v1185_v60 }
 0xadb   :  { %v1211_v14 = vor.u32 1.1754944e-38, %v1210_v10  ;;  %vm1209_vm3 = vcmp.eq.f32.partialorder %v1208_v12, 8.507059e+37 }
 0xadc   :  { %v1187_v0 = vmul.f32 %v1443_v59, %v1186_v62 }
 0xade   :  { %v1188_v2 = vadd.f32 %v1443_v59, %v1187_v0 }
 0xadf   :  { %v1445_v3 = vpop.eup %1444 }
 0xae0   :  { %v1192_v5 = vsel %vm1191_vm13, %v1443_v59, %v1188_v2  ;;  %v1200_v6 = vmul.f32 %v1445_v3, %v1183_v61  ;;  %vm1205_vm15 = vweird.f32 %v1445_v3 }
 0xae1   :  { %v1197_v7 = vsel %vm1194_vm14, %v1196_v4, %v1192_v5  ;;  %vm1206_vm1 = vmor %vm1204_vm0, %vm1205_vm15 }
 0xae2   :  { %v1201_v8 = vsub.f32 1.0, %v1200_v6  ;;  %v1198_v9 = vmul.f32 %v1439_v50, %v1197_v7 }
 0xae4   :  { %v1202_v11 = vmul.f32 %v1445_v3, %v1201_v8  ;;  %1397 = vmatmul.msk.f32.vlgmr.msrb.gmra.mxu0 %vm1165_vm10, %v1198_v9  ;;  %1350 = vst.msk [vmem:[%s1872_s13] sm:$0xff] %vm1165_vm10, %v1198_v9 }
 0xae6   :  { %v1203_v13 = vadd.f32 %v1445_v3, %v1202_v11 }
 0xae8   :  { %v1207_v15 = vsel %vm1206_vm1, %v1445_v3, %v1203_v13 }
 0xae9   :  { %v1212_v16 = vsel %vm1209_vm3, %v1211_v14, %v1207_v15 }
 0xaea   :  { %v1213_v17 = vmul.f32 %v1441_v53, %v1212_v16 }
 0xaec   :  { %1351 = vst.msk [vmem:[%s1872_s13 + $0x8] sm:$0xff] %vm1165_vm10, %v1213_v17  ;;  %1398 = vmatmul.msk.f32.vlgmr.msrb.gmra.mxu1 %vm1165_vm10, %v1213_v17 }
 0xb61   :  { %v1234_v19 = vpop.f32.mrf.mxu0 }
 0xb62   :  { %1401 = vmatmul.msk.f32.vlgmr.msra.gmra.mxu0 %vm466_vm2, %v1234_v19 }
 0xb69   :  { %v1257_v20 = vpop.f32.mrf.mxu1 }
 0xb6a   :  { %1402 = vmatmul.msk.f32.vlgmr.msra.gmra.mxu1 %vm466_vm2, %v1257_v20 }
 0xbdf   :  { %v1320_v22 = vpop.f32.mrf.mxu0 }
 0xbe0   :  { %v1321_v23 = vadd.f32 %v1320_v22, %v1277_v21 }
 0xbe2   :  { %1446 = vtanh.f32 %v1321_v23 }
 0xbe7   :  { %v1343_v25 = vpop.f32.mrf.mxu1 }
 0xbe8   :  { %v1447_v26 = vpop.eup %1446  ;;  %v1344_v27 = vadd.f32 %v1343_v25, %v1297_v24 }
 0xbe9   :  { %1348 = vst.msk [vmem:[%s1873_s12] sm:$0xff] %vm466_vm2, %v1447_v26 }
 0xbea   :  { %1448 = vtanh.f32 %v1344_v27 }
 0xbf0   :  { %v1449_v28 = vpop.eup %1448 }
 0xbf1   :  { %1349 = vst.msk [vmem:[%s1873_s12 + $0x8] sm:$0xff] %vm466_vm2, %v1449_v28 }

</bundles_post_ra>
